<compile_context>
chip_gen: v7x
topology: tpu7x:2x2x1
jax: 0.10.0
libtpu: 0.0.40
codegen_flags: <defaults>
</compile_context>

<pallas_src>
import functools

import jax
import jax.numpy as jnp
from jax import lax
from jax.experimental import pallas as pl
from jax.experimental.pallas import tpu as pltpu

HIGHEST = lax.Precision.HIGHEST  # reference only; kernel uses DEFAULT precision


# ----------------------------------------------------------------------------
# Pallas kernel: LSTM stack recurrence + last-timestep selection + projection
# ----------------------------------------------------------------------------
def _lstm_kernel(num_layers, hidden_size, seq_len, batch_block, time_unroll,
                 *refs):
    # refs:
    #   x_ref      (1, L*bn, D)   input tile, row t*bn+j = (time t, batch j)
    #   len_ref    (bn, 1) i32    clamped sequence lengths
    #   w_ih0_ref  (D, 4H)        layer-0 input weights, transposed
    #   b0_ref     (1, 4H)        layer-0 combined bias
    #   w_hh0_ref  (H, 4H)        layer-0 recurrent weights, transposed
    #   per layer l>=1: w_ih_T (H, 4H), w_hh_T (H, 4H), b (1, 4H)
    #   w_out_ref  (H, O_pad)     output head, transposed + lane-padded
    #   b_out_ref  (1, O_pad)
    #   out_ref    (bn, O_pad)
    #   gates_ref  (L*bn, 4H) f32 VMEM scratch: hoisted input projection
    #   seq_ref    (L*bn, H)  f32 VMEM scratch: current layer's output sequence
    H = hidden_size
    L = seq_len
    bn = batch_block

    x_ref = refs[0]
    len_ref = refs[1]
    w_ih0_ref = refs[2]
    b0_ref = refs[3]
    w_hh0_ref = refs[4]
    layer_refs = refs[5:5 + 3 * (num_layers - 1)]
    base = 5 + 3 * (num_layers - 1)
    w_out_ref = refs[base]
    b_out_ref = refs[base + 1]
    out_ref = refs[base + 2]
    gates_ref = refs[base + 3]
    seq_ref = refs[base + 4]

    lengths = len_ref[...]                              # (bn, 1) int32
    zeros = jnp.zeros((bn, H), jnp.float32)

    last_h = zeros
    for l in range(num_layers):
        is_last = (l == num_layers - 1)

        # ---- hoisted input projection (off the serial path): one big matmul
        #      per layer, written to VMEM scratch. DEFAULT precision = one
        #      bf16 MXU pass.
        if l == 0:
            w_hh = w_hh0_ref[...]
            gates_ref[...] = (
                jnp.dot(x_ref[0], w_ih0_ref[...],
                        preferred_element_type=jnp.float32) + b0_ref[...])
        else:
            w_ih = layer_refs[3 * (l - 1)][...]
            w_hh = layer_refs[3 * (l - 1) + 1][...]
            b = layer_refs[3 * (l - 1) + 2][...]
            # seq_ref still holds the previous layer's full output sequence;
            # it is only overwritten later, inside this layer's time loop.
            gates_ref[...] = (
                jnp.dot(seq_ref[...], w_ih,
                        preferred_element_type=jnp.float32) + b)

        # ---- serial recurrence: only gates[t] + h @ W_hh^T per step ----
        def step(t, carry, is_last=is_last, w_hh=w_hh):
            h, c, last_h = carry
            row = pl.multiple_of(t * bn, bn)
            gates = gates_ref[pl.ds(row, bn), :] + jnp.dot(
                h, w_hh, preferred_element_type=jnp.float32)
            # Full-tile transcendentals on the (bn, 4H=128-lane) gates (EUP),
            # then lane-slice.  PyTorch gate order: i, f, g, o.
            sig = jax.nn.sigmoid(gates)
            th = jnp.tanh(gates)
            i_g = sig[:, 0 * H:1 * H]
            f_g = sig[:, 1 * H:2 * H]
            g_g = th[:, 2 * H:3 * H]
            o_g = sig[:, 3 * H:4 * H]
            c = f_g * c + i_g * g_g
            h = o_g * jnp.tanh(c)
            if not is_last:
                # Feeds the next layer's hoisted projection (sublane-aligned:
                # bn is a multiple of 8).  TODO(synk): bf16 at production H.
                seq_ref[pl.ds(row, bn), :] = h
            else:
                # Zero-padding-aware "last timestep": keep h where t+1 == len.
                last_h = jnp.where(lengths == (t + 1), h, last_h)
            return h, c, last_h

        _, _, last_h = lax.fori_loop(0, L, step, (zeros, zeros, last_h),
                                     unroll=time_unroll)

    # Lane-dense output projection (O padded to 128 lanes in the wrapper).
    out = jnp.dot(last_h, w_out_ref[...],
                  preferred_element_type=jnp.float32) + b_out_ref[...]
    out_ref[...] = out.astype(out_ref.dtype)


# ----------------------------------------------------------------------------
# Wrapper
# ----------------------------------------------------------------------------
def _pick_batch_block(n):
    """Fill MXU sublanes at large N, keep >=2 grid steps for v7x's 2 TCs."""
    n8 = max(8, ((n + 7) // 8) * 8)
    bn = min(256, n8)
    if bn == n8 and n8 >= 16:
        bn = max(8, (n8 // 2 // 8) * 8)
    return bn


def basic_lstm_forward(x, lengths, params, *, hidden_size, num_layers,
                       output_dim, batch_block=None):
    """x: (N, L, D) float32 batch-first. lengths: (N,) int32. -> (N, output_dim)."""
    N, L, D = x.shape
    H = hidden_size
    bn = _pick_batch_block(N) if batch_block is None else batch_block
    n_pad = ((N + bn - 1) // bn) * bn
    n_tiles = n_pad // bn
    o_pad = ((output_dim + 127) // 128) * 128

    # Clamp lengths to [1, L]: matches the reference's clamped gather (PyTorch
    # itself would raise on an out-of-range gather index).
    lengths = jnp.clip(lengths.astype(jnp.int32), 1, L)

    # time-major, batch padded, then regrouped so each batch tile is one
    # contiguous (L*bn, D) slab with row t*bn+j = (time t, batch j of the tile).
    x_tm = jnp.transpose(x, (1, 0, 2)).astype(jnp.float32)            # (L, N, D)
    x_tm = jnp.pad(x_tm, ((0, 0), (0, n_pad - N), (0, 0)))            # (L, n_pad, D)
    x_tiles = (x_tm.reshape(L, n_tiles, bn, D)
               .transpose(1, 0, 2, 3)
               .reshape(n_tiles, L * bn, D))
    len_pad = jnp.pad(lengths, (0, n_pad - N),
                      constant_values=1).reshape(n_pad, 1)            # (n_pad, 1)

    b0 = (params["b_ih_0"] + params["b_hh_0"]).reshape(1, -1)
    # Lane-pad the output head to 128 columns (unmasked vst in the kernel).
    w_out_pad = jnp.zeros((H, o_pad), jnp.float32).at[:, :output_dim].set(
        params["w_out"].T)
    b_out_pad = jnp.zeros((1, o_pad), jnp.float32).at[:, :output_dim].set(
        params["b_out"].reshape(1, -1))

    inputs = [x_tiles, len_pad, params["w_ih_0"].T.astype(jnp.float32), b0,
              params["w_hh_0"].T]
    for l in range(1, num_layers):
        b = (params[f"b_ih_{l}"] + params[f"b_hh_{l}"]).reshape(1, -1)
        inputs += [params[f"w_ih_{l}"].T, params[f"w_hh_{l}"].T, b]
    inputs += [w_out_pad, b_out_pad]

    def _full_spec(shape):
        nd = len(shape)
        return pl.BlockSpec(shape, lambda i, nd=nd: (0,) * nd)

    in_specs = [
        pl.BlockSpec((1, L * bn, D), lambda i: (i, 0, 0)),   # x: tile batch
        pl.BlockSpec((bn, 1), lambda i: (i, 0)),             # lengths: tile batch
    ] + [_full_spec(a.shape) for a in inputs[2:]]            # weights: resident

    time_unroll = L if L <= 8 else 8
    kernel = functools.partial(_lstm_kernel, num_layers, H, L, bn, time_unroll)

    out = pl.pallas_call(
        kernel,
        out_shape=jax.ShapeDtypeStruct((n_pad, o_pad), jnp.float32),
        grid=(n_tiles,),
        in_specs=in_specs,
        out_specs=pl.BlockSpec((bn, o_pad), lambda i: (i, 0)),
        scratch_shapes=[
            pltpu.VMEM((L * bn, 4 * H), jnp.float32),   # hoisted gate projections
            pltpu.VMEM((L * bn, H), jnp.float32),       # inter-layer sequence
        ],
        compiler_params=pltpu.CompilerParams(
            dimension_semantics=("parallel",),
            vmem_limit_bytes=32 * 1024 * 1024),
    )(*inputs)
    return out[:N, :output_dim]


# ----------------------------------------------------------------------------
# Pure-JAX reference (mirrors the PyTorch forward) for the parity check
# ----------------------------------------------------------------------------
def basic_lstm_reference(x, lengths, params, *, hidden_size, num_layers):
    N, L, D = x.shape
    h_seq = x.astype(jnp.float32)
    for l in range(num_layers):
        w_ih = params[f"w_ih_{l}"]
        w_hh = params[f"w_hh_{l}"]
        b = params[f"b_ih_{l}"] + params[f"b_hh_{l}"]

        def step(carry, x_t):
            h, c = carry
            gates = (jnp.dot(x_t, w_ih.T, precision=HIGHEST)
                     + jnp.dot(h, w_hh.T, precision=HIGHEST) + b)
            i_g, f_g, g_g, o_g = jnp.split(gates, 4, axis=-1)
            i_g = jax.nn.sigmoid(i_g)
            f_g = jax.nn.sigmoid(f_g)
            g_g = jnp.tanh(g_g)
            o_g = jax.nn.sigmoid(o_g)
            c = f_g * c + i_g * g_g
            h = o_g * jnp.tanh(c)
            return (h, c), h

        h0 = jnp.zeros((N, hidden_size), jnp.float32)
        c0 = jnp.zeros((N, hidden_size), jnp.float32)
        _, hs = lax.scan(step, (h0, c0), jnp.transpose(h_seq, (1, 0, 2)))
        h_seq = jnp.transpose(hs, (1, 0, 2))
    last = h_seq[jnp.arange(N), lengths - 1]
    return jnp.dot(last, params["w_out"].T, precision=HIGHEST) + params["b_out"]


# ----------------------------------------------------------------------------
# Main
# ----------------------------------------------------------------------------
if __name__ == "__main__":
    # module config: BasicLSTM(input_dim=16, hidden_size=32, output_dim=5, num_layers=2)
    N, L, D = 2, 8, 16
    H, O, NUM_LAYERS = 32, 5, 2

    key = jax.random.PRNGKey(0)
    k_x, key = jax.random.split(key)
    x = jax.random.normal(k_x, (N, L, D), dtype=jnp.float32)
    lengths = jnp.array([8, 5], dtype=jnp.int32)

    # deterministic parameter init (PyTorch LSTM-style uniform(-1/sqrt(H), 1/sqrt(H)))
    bound = 1.0 / jnp.sqrt(jnp.float32(H))
    params = {}
    for l in range(NUM_LAYERS):
        din = D if l == 0 else H
        for name, shape in (
            (f"w_ih_{l}", (4 * H, din)),
            (f"w_hh_{l}", (4 * H, H)),
            (f"b_ih_{l}", (4 * H,)),
            (f"b_hh_{l}", (4 * H,)),
        ):
            key, sub = jax.random.split(key)
            params[name] = jax.random.uniform(sub, shape, jnp.float32, -bound, bound)
    key, sub = jax.random.split(key)
    params["w_out"] = jax.random.uniform(sub, (O, H), jnp.float32, -bound, bound)
    key, sub = jax.random.split(key)
    params["b_out"] = jax.random.uniform(sub, (O,), jnp.float32, -bound, bound)

    out = basic_lstm_forward(
        x, lengths, params, hidden_size=H, num_layers=NUM_LAYERS, output_dim=O
    )
    out = jax.block_until_ready(out)

    ref = basic_lstm_reference(x, lengths, params, hidden_size=H, num_layers=NUM_LAYERS)
    assert out.shape == (N, O), out.shape
    assert jnp.all(jnp.isfinite(out))
    # Tolerance loosened to 2e-2: kernel matmuls use DEFAULT precision
    # (single-pass bf16 MXU) and LSTM recurrences compound rounding over L steps.
    assert jnp.allclose(out, ref, rtol=2e-2, atol=2e-2), (out, ref)

    print("KERNEL_OK")
</pallas_src>

<mosaic_0001>
module attributes {stable_mosaic.version = 11 : i64} {
  func.func @_lstm_kernel(%arg0: i32, %arg1: memref<1x64x16xf32, #tpu.memory_space<vmem>>, %arg2: memref<8x1xi32, #tpu.memory_space<vmem>>, %arg3: memref<16x128xf32, #tpu.memory_space<vmem>>, %arg4: memref<1x128xf32, #tpu.memory_space<vmem>>, %arg5: memref<32x128xf32, #tpu.memory_space<vmem>>, %arg6: memref<32x128xf32, #tpu.memory_space<vmem>>, %arg7: memref<32x128xf32, #tpu.memory_space<vmem>>, %arg8: memref<1x128xf32, #tpu.memory_space<vmem>>, %arg9: memref<32x128xf32, #tpu.memory_space<vmem>>, %arg10: memref<1x128xf32, #tpu.memory_space<vmem>>, %arg11: memref<8x128xf32, #tpu.memory_space<vmem>>, %arg12: memref<64x128xf32, #tpu.memory_space<vmem>>, %arg13: memref<64x32xf32, #tpu.memory_space<vmem>>) attributes {dimension_semantics = [#tpu.dimension_semantics<parallel>], iteration_bounds = array<i64: 1>, scalar_prefetch = 0 : i64, scratch_operands = 2 : i64, tpu.core_type = #tpu.core_type<tc>, window_params = [{transform_indices = @transform_0, window_bounds = array<i64: 1, 64, 16>}, {transform_indices = @transform_1, window_bounds = array<i64: 8, 1>}, {pipeline_mode = #tpu.pipeline_mode<synchronous>, transform_indices = @transform_2, window_bounds = array<i64: 16, 128>}, {pipeline_mode = #tpu.pipeline_mode<synchronous>, transform_indices = @transform_3, window_bounds = array<i64: 1, 128>}, {pipeline_mode = #tpu.pipeline_mode<synchronous>, transform_indices = @transform_4, window_bounds = array<i64: 32, 128>}, {pipeline_mode = #tpu.pipeline_mode<synchronous>, transform_indices = @transform_5, window_bounds = array<i64: 32, 128>}, {pipeline_mode = #tpu.pipeline_mode<synchronous>, transform_indices = @transform_6, window_bounds = array<i64: 32, 128>}, {pipeline_mode = #tpu.pipeline_mode<synchronous>, transform_indices = @transform_7, window_bounds = array<i64: 1, 128>}, {pipeline_mode = #tpu.pipeline_mode<synchronous>, transform_indices = @transform_8, window_bounds = array<i64: 32, 128>}, {pipeline_mode = #tpu.pipeline_mode<synchronous>, transform_indices = @transform_9, window_bounds = array<i64: 1, 128>}, {transform_indices = @transform_10, window_bounds = array<i64: 8, 128>}]} {
    %c0 = arith.constant 0 : index
    %c0_0 = arith.constant 0 : index
    %0 = vector.load %arg2[%c0, %c0_0] : memref<8x1xi32, #tpu.memory_space<vmem>>, vector<8x1xi32>
    %cst = arith.constant 0.000000e+00 : f32
    %1 = vector.broadcast %cst : f32 to vector<8x32xf32>
    %c0_1 = arith.constant 0 : index
    %c0_2 = arith.constant 0 : index
    %2 = vector.load %arg5[%c0_1, %c0_2] : memref<32x128xf32, #tpu.memory_space<vmem>>, vector<32x128xf32>
    %c0_3 = arith.constant 0 : index
    %c0_4 = arith.constant 0 : index
    %c0_5 = arith.constant 0 : index
    %3 = vector.load %arg1[%c0_3, %c0_4, %c0_5] : memref<1x64x16xf32, #tpu.memory_space<vmem>>, vector<1x64x16xf32>
    %4 = vector.shape_cast %3 : vector<1x64x16xf32> to vector<64x16xf32>
    %c0_6 = arith.constant 0 : index
    %c0_7 = arith.constant 0 : index
    %5 = vector.load %arg3[%c0_6, %c0_7] : memref<16x128xf32, #tpu.memory_space<vmem>>, vector<16x128xf32>
    %cst_8 = arith.constant dense<0.000000e+00> : vector<64x128xf32>
    %6 = tpu.matmul %4, %5, %cst_8 {dimension_numbers = #tpu.dot_dimension_numbers<[1], [0], [0], [1], [0, 0, 1, 1], [], []>} : vector<64x16xf32>, vector<16x128xf32>, vector<64x128xf32> -> vector<64x128xf32>
    %c0_9 = arith.constant 0 : index
    %c0_10 = arith.constant 0 : index
    %7 = vector.load %arg4[%c0_9, %c0_10] : memref<1x128xf32, #tpu.memory_space<vmem>>, vector<1x128xf32>
    %8 = vector.broadcast %7 : vector<1x128xf32> to vector<64x128xf32>
    %9 = arith.addf %6, %8 : vector<64x128xf32>
    %c0_11 = arith.constant 0 : index
    %c0_12 = arith.constant 0 : index
    %10 = vector.load %arg12[%c0_11, %c0_12] : memref<64x128xf32, #tpu.memory_space<vmem>>, vector<64x128xf32>
    tpu.vector_store %arg12[%c0_11, %c0_12], %9 {strides = array<i32>} : memref<64x128xf32, #tpu.memory_space<vmem>>, vector<64x128xf32>,
    %c0_i32 = arith.constant 0 : i32
    %c8_i32 = arith.constant 8 : i32
    %11 = arith.muli %c0_i32, %c8_i32 : i32
    %12 = tpu.assume_multiple %11, 8 : i32
    %13 = arith.index_cast %12 : i32 to index
    %c0_13 = arith.constant 0 : index
    %14 = vector.load %arg12[%13, %c0_13] : memref<64x128xf32, #tpu.memory_space<vmem>>, vector<8x128xf32>
    %cst_14 = arith.constant dense<0.000000e+00> : vector<8x128xf32>
    %15 = tpu.matmul %1, %2, %cst_14 {dimension_numbers = #tpu.dot_dimension_numbers<[1], [0], [0], [1], [0, 0, 1, 1], [], []>} : vector<8x32xf32>, vector<32x128xf32>, vector<8x128xf32> -> vector<8x128xf32>
    %16 = arith.addf %14, %15 : vector<8x128xf32>
    %17 = arith.negf %16 : vector<8x128xf32>
    %18 = math.exp %17 : vector<8x128xf32>
    %cst_15 = arith.constant 1.000000e+00 : f32
    %19 = vector.broadcast %cst_15 : f32 to vector<8x128xf32>
    %20 = arith.addf %19, %18 : vector<8x128xf32>
    %21 = arith.divf %19, %20 : vector<8x128xf32>
    %22 = math.tanh %16 : vector<8x128xf32>
    %23 = vector.extract_strided_slice %21 {offsets = [0, 0], sizes = [8, 32], strides = [1, 1]} : vector<8x128xf32> to vector<8x32xf32>
    %24 = vector.extract_strided_slice %21 {offsets = [0, 32], sizes = [8, 32], strides = [1, 1]} : vector<8x128xf32> to vector<8x32xf32>
    %25 = vector.extract_strided_slice %22 {offsets = [0, 64], sizes = [8, 32], strides = [1, 1]} : vector<8x128xf32> to vector<8x32xf32>
    %26 = vector.extract_strided_slice %21 {offsets = [0, 96], sizes = [8, 32], strides = [1, 1]} : vector<8x128xf32> to vector<8x32xf32>
    %27 = arith.mulf %24, %1 : vector<8x32xf32>
    %28 = arith.mulf %23, %25 : vector<8x32xf32>
    %29 = arith.addf %27, %28 : vector<8x32xf32>
    %30 = math.tanh %29 : vector<8x32xf32>
    %31 = arith.mulf %26, %30 : vector<8x32xf32>
    %32 = arith.index_cast %12 : i32 to index
    %c0_16 = arith.constant 0 : index
    %33 = vector.load %arg13[%32, %c0_16] : memref<64x32xf32, #tpu.memory_space<vmem>>, vector<8x32xf32>
    tpu.vector_store %arg13[%32, %c0_16], %31 {strides = array<i32>} : memref<64x32xf32, #tpu.memory_space<vmem>>, vector<8x32xf32>,
    %c1_i32 = arith.constant 1 : i32
    %c8_i32_17 = arith.constant 8 : i32
    %34 = arith.muli %c1_i32, %c8_i32_17 : i32
    %35 = tpu.assume_multiple %34, 8 : i32
    %36 = arith.index_cast %35 : i32 to index
    %c0_18 = arith.constant 0 : index
    %37 = vector.load %arg12[%36, %c0_18] : memref<64x128xf32, #tpu.memory_space<vmem>>, vector<8x128xf32>
    %cst_19 = arith.constant dense<0.000000e+00> : vector<8x128xf32>
    %38 = tpu.matmul %31, %2, %cst_19 {dimension_numbers = #tpu.dot_dimension_numbers<[1], [0], [0], [1], [0, 0, 1, 1], [], []>} : vector<8x32xf32>, vector<32x128xf32>, vector<8x128xf32> -> vector<8x128xf32>
    %39 = arith.addf %37, %38 : vector<8x128xf32>
    %40 = arith.negf %39 : vector<8x128xf32>
    %41 = math.exp %40 : vector<8x128xf32>
    %cst_20 = arith.constant 1.000000e+00 : f32
    %42 = vector.broadcast %cst_20 : f32 to vector<8x128xf32>
    %43 = arith.addf %42, %41 : vector<8x128xf32>
    %44 = arith.divf %42, %43 : vector<8x128xf32>
    %45 = math.tanh %39 : vector<8x128xf32>
    %46 = vector.extract_strided_slice %44 {offsets = [0, 0], sizes = [8, 32], strides = [1, 1]} : vector<8x128xf32> to vector<8x32xf32>
    %47 = vector.extract_strided_slice %44 {offsets = [0, 32], sizes = [8, 32], strides = [1, 1]} : vector<8x128xf32> to vector<8x32xf32>
    %48 = vector.extract_strided_slice %45 {offsets = [0, 64], sizes = [8, 32], strides = [1, 1]} : vector<8x128xf32> to vector<8x32xf32>
    %49 = vector.extract_strided_slice %44 {offsets = [0, 96], sizes = [8, 32], strides = [1, 1]} : vector<8x128xf32> to vector<8x32xf32>
    %50 = arith.mulf %47, %29 : vector<8x32xf32>
    %51 = arith.mulf %46, %48 : vector<8x32xf32>
    %52 = arith.addf %50, %51 : vector<8x32xf32>
    %53 = math.tanh %52 : vector<8x32xf32>
    %54 = arith.mulf %49, %53 : vector<8x32xf32>
    %55 = arith.index_cast %35 : i32 to index
    %c0_21 = arith.constant 0 : index
    %56 = vector.load %arg13[%55, %c0_21] : memref<64x32xf32, #tpu.memory_space<vmem>>, vector<8x32xf32>
    tpu.vector_store %arg13[%55, %c0_21], %54 {strides = array<i32>} : memref<64x32xf32, #tpu.memory_space<vmem>>, vector<8x32xf32>,
    %c2_i32 = arith.constant 2 : i32
    %c8_i32_22 = arith.constant 8 : i32
    %57 = arith.muli %c2_i32, %c8_i32_22 : i32
    %58 = tpu.assume_multiple %57, 8 : i32
    %59 = arith.index_cast %58 : i32 to index
    %c0_23 = arith.constant 0 : index
    %60 = vector.load %arg12[%59, %c0_23] : memref<64x128xf32, #tpu.memory_space<vmem>>, vector<8x128xf32>
    %cst_24 = arith.constant dense<0.000000e+00> : vector<8x128xf32>
    %61 = tpu.matmul %54, %2, %cst_24 {dimension_numbers = #tpu.dot_dimension_numbers<[1], [0], [0], [1], [0, 0, 1, 1], [], []>} : vector<8x32xf32>, vector<32x128xf32>, vector<8x128xf32> -> vector<8x128xf32>
    %62 = arith.addf %60, %61 : vector<8x128xf32>
    %63 = arith.negf %62 : vector<8x128xf32>
    %64 = math.exp %63 : vector<8x128xf32>
    %cst_25 = arith.constant 1.000000e+00 : f32
    %65 = vector.broadcast %cst_25 : f32 to vector<8x128xf32>
    %66 = arith.addf %65, %64 : vector<8x128xf32>
    %67 = arith.divf %65, %66 : vector<8x128xf32>
    %68 = math.tanh %62 : vector<8x128xf32>
    %69 = vector.extract_strided_slice %67 {offsets = [0, 0], sizes = [8, 32], strides = [1, 1]} : vector<8x128xf32> to vector<8x32xf32>
    %70 = vector.extract_strided_slice %67 {offsets = [0, 32], sizes = [8, 32], strides = [1, 1]} : vector<8x128xf32> to vector<8x32xf32>
    %71 = vector.extract_strided_slice %68 {offsets = [0, 64], sizes = [8, 32], strides = [1, 1]} : vector<8x128xf32> to vector<8x32xf32>
    %72 = vector.extract_strided_slice %67 {offsets = [0, 96], sizes = [8, 32], strides = [1, 1]} : vector<8x128xf32> to vector<8x32xf32>
    %73 = arith.mulf %70, %52 : vector<8x32xf32>
    %74 = arith.mulf %69, %71 : vector<8x32xf32>
    %75 = arith.addf %73, %74 : vector<8x32xf32>
    %76 = math.tanh %75 : vector<8x32xf32>
    %77 = arith.mulf %72, %76 : vector<8x32xf32>
    %78 = arith.index_cast %58 : i32 to index
    %c0_26 = arith.constant 0 : index
    %79 = vector.load %arg13[%78, %c0_26] : memref<64x32xf32, #tpu.memory_space<vmem>>, vector<8x32xf32>
    tpu.vector_store %arg13[%78, %c0_26], %77 {strides = array<i32>} : memref<64x32xf32, #tpu.memory_space<vmem>>, vector<8x32xf32>,
    %c3_i32 = arith.constant 3 : i32
    %c8_i32_27 = arith.constant 8 : i32
    %80 = arith.muli %c3_i32, %c8_i32_27 : i32
    %81 = tpu.assume_multiple %80, 8 : i32
    %82 = arith.index_cast %81 : i32 to index
    %c0_28 = arith.constant 0 : index
    %83 = vector.load %arg12[%82, %c0_28] : memref<64x128xf32, #tpu.memory_space<vmem>>, vector<8x128xf32>
    %cst_29 = arith.constant dense<0.000000e+00> : vector<8x128xf32>
    %84 = tpu.matmul %77, %2, %cst_29 {dimension_numbers = #tpu.dot_dimension_numbers<[1], [0], [0], [1], [0, 0, 1, 1], [], []>} : vector<8x32xf32>, vector<32x128xf32>, vector<8x128xf32> -> vector<8x128xf32>
    %85 = arith.addf %83, %84 : vector<8x128xf32>
    %86 = arith.negf %85 : vector<8x128xf32>
    %87 = math.exp %86 : vector<8x128xf32>
    %cst_30 = arith.constant 1.000000e+00 : f32
    %88 = vector.broadcast %cst_30 : f32 to vector<8x128xf32>
    %89 = arith.addf %88, %87 : vector<8x128xf32>
    %90 = arith.divf %88, %89 : vector<8x128xf32>
    %91 = math.tanh %85 : vector<8x128xf32>
    %92 = vector.extract_strided_slice %90 {offsets = [0, 0], sizes = [8, 32], strides = [1, 1]} : vector<8x128xf32> to vector<8x32xf32>
    %93 = vector.extract_strided_slice %90 {offsets = [0, 32], sizes = [8, 32], strides = [1, 1]} : vector<8x128xf32> to vector<8x32xf32>
    %94 = vector.extract_strided_slice %91 {offsets = [0, 64], sizes = [8, 32], strides = [1, 1]} : vector<8x128xf32> to vector<8x32xf32>
    %95 = vector.extract_strided_slice %90 {offsets = [0, 96], sizes = [8, 32], strides = [1, 1]} : vector<8x128xf32> to vector<8x32xf32>
    %96 = arith.mulf %93, %75 : vector<8x32xf32>
    %97 = arith.mulf %92, %94 : vector<8x32xf32>
    %98 = arith.addf %96, %97 : vector<8x32xf32>
    %99 = math.tanh %98 : vector<8x32xf32>
    %100 = arith.mulf %95, %99 : vector<8x32xf32>
    %101 = arith.index_cast %81 : i32 to index
    %c0_31 = arith.constant 0 : index
    %102 = vector.load %arg13[%101, %c0_31] : memref<64x32xf32, #tpu.memory_space<vmem>>, vector<8x32xf32>
    tpu.vector_store %arg13[%101, %c0_31], %100 {strides = array<i32>} : memref<64x32xf32, #tpu.memory_space<vmem>>, vector<8x32xf32>,
    %c4_i32 = arith.constant 4 : i32
    %c8_i32_32 = arith.constant 8 : i32
    %103 = arith.muli %c4_i32, %c8_i32_32 : i32
    %104 = tpu.assume_multiple %103, 8 : i32
    %105 = arith.index_cast %104 : i32 to index
    %c0_33 = arith.constant 0 : index
    %106 = vector.load %arg12[%105, %c0_33] : memref<64x128xf32, #tpu.memory_space<vmem>>, vector<8x128xf32>
    %cst_34 = arith.constant dense<0.000000e+00> : vector<8x128xf32>
    %107 = tpu.matmul %100, %2, %cst_34 {dimension_numbers = #tpu.dot_dimension_numbers<[1], [0], [0], [1], [0, 0, 1, 1], [], []>} : vector<8x32xf32>, vector<32x128xf32>, vector<8x128xf32> -> vector<8x128xf32>
    %108 = arith.addf %106, %107 : vector<8x128xf32>
    %109 = arith.negf %108 : vector<8x128xf32>
    %110 = math.exp %109 : vector<8x128xf32>
    %cst_35 = arith.constant 1.000000e+00 : f32
    %111 = vector.broadcast %cst_35 : f32 to vector<8x128xf32>
    %112 = arith.addf %111, %110 : vector<8x128xf32>
    %113 = arith.divf %111, %112 : vector<8x128xf32>
    %114 = math.tanh %108 : vector<8x128xf32>
    %115 = vector.extract_strided_slice %113 {offsets = [0, 0], sizes = [8, 32], strides = [1, 1]} : vector<8x128xf32> to vector<8x32xf32>
    %116 = vector.extract_strided_slice %113 {offsets = [0, 32], sizes = [8, 32], strides = [1, 1]} : vector<8x128xf32> to vector<8x32xf32>
    %117 = vector.extract_strided_slice %114 {offsets = [0, 64], sizes = [8, 32], strides = [1, 1]} : vector<8x128xf32> to vector<8x32xf32>
    %118 = vector.extract_strided_slice %113 {offsets = [0, 96], sizes = [8, 32], strides = [1, 1]} : vector<8x128xf32> to vector<8x32xf32>
    %119 = arith.mulf %116, %98 : vector<8x32xf32>
    %120 = arith.mulf %115, %117 : vector<8x32xf32>
    %121 = arith.addf %119, %120 : vector<8x32xf32>
    %122 = math.tanh %121 : vector<8x32xf32>
    %123 = arith.mulf %118, %122 : vector<8x32xf32>
    %124 = arith.index_cast %104 : i32 to index
    %c0_36 = arith.constant 0 : index
    %125 = vector.load %arg13[%124, %c0_36] : memref<64x32xf32, #tpu.memory_space<vmem>>, vector<8x32xf32>
    tpu.vector_store %arg13[%124, %c0_36], %123 {strides = array<i32>} : memref<64x32xf32, #tpu.memory_space<vmem>>, vector<8x32xf32>,
    %c5_i32 = arith.constant 5 : i32
    %c8_i32_37 = arith.constant 8 : i32
    %126 = arith.muli %c5_i32, %c8_i32_37 : i32
    %127 = tpu.assume_multiple %126, 8 : i32
    %128 = arith.index_cast %127 : i32 to index
    %c0_38 = arith.constant 0 : index
    %129 = vector.load %arg12[%128, %c0_38] : memref<64x128xf32, #tpu.memory_space<vmem>>, vector<8x128xf32>
    %cst_39 = arith.constant dense<0.000000e+00> : vector<8x128xf32>
    %130 = tpu.matmul %123, %2, %cst_39 {dimension_numbers = #tpu.dot_dimension_numbers<[1], [0], [0], [1], [0, 0, 1, 1], [], []>} : vector<8x32xf32>, vector<32x128xf32>, vector<8x128xf32> -> vector<8x128xf32>
    %131 = arith.addf %129, %130 : vector<8x128xf32>
    %132 = arith.negf %131 : vector<8x128xf32>
    %133 = math.exp %132 : vector<8x128xf32>
    %cst_40 = arith.constant 1.000000e+00 : f32
    %134 = vector.broadcast %cst_40 : f32 to vector<8x128xf32>
    %135 = arith.addf %134, %133 : vector<8x128xf32>
    %136 = arith.divf %134, %135 : vector<8x128xf32>
    %137 = math.tanh %131 : vector<8x128xf32>
    %138 = vector.extract_strided_slice %136 {offsets = [0, 0], sizes = [8, 32], strides = [1, 1]} : vector<8x128xf32> to vector<8x32xf32>
    %139 = vector.extract_strided_slice %136 {offsets = [0, 32], sizes = [8, 32], strides = [1, 1]} : vector<8x128xf32> to vector<8x32xf32>
    %140 = vector.extract_strided_slice %137 {offsets = [0, 64], sizes = [8, 32], strides = [1, 1]} : vector<8x128xf32> to vector<8x32xf32>
    %141 = vector.extract_strided_slice %136 {offsets = [0, 96], sizes = [8, 32], strides = [1, 1]} : vector<8x128xf32> to vector<8x32xf32>
    %142 = arith.mulf %139, %121 : vector<8x32xf32>
    %143 = arith.mulf %138, %140 : vector<8x32xf32>
    %144 = arith.addf %142, %143 : vector<8x32xf32>
    %145 = math.tanh %144 : vector<8x32xf32>
    %146 = arith.mulf %141, %145 : vector<8x32xf32>
    %147 = arith.index_cast %127 : i32 to index
    %c0_41 = arith.constant 0 : index
    %148 = vector.load %arg13[%147, %c0_41] : memref<64x32xf32, #tpu.memory_space<vmem>>, vector<8x32xf32>
    tpu.vector_store %arg13[%147, %c0_41], %146 {strides = array<i32>} : memref<64x32xf32, #tpu.memory_space<vmem>>, vector<8x32xf32>,
    %c6_i32 = arith.constant 6 : i32
    %c8_i32_42 = arith.constant 8 : i32
    %149 = arith.muli %c6_i32, %c8_i32_42 : i32
    %150 = tpu.assume_multiple %149, 8 : i32
    %151 = arith.index_cast %150 : i32 to index
    %c0_43 = arith.constant 0 : index
    %152 = vector.load %arg12[%151, %c0_43] : memref<64x128xf32, #tpu.memory_space<vmem>>, vector<8x128xf32>
    %cst_44 = arith.constant dense<0.000000e+00> : vector<8x128xf32>
    %153 = tpu.matmul %146, %2, %cst_44 {dimension_numbers = #tpu.dot_dimension_numbers<[1], [0], [0], [1], [0, 0, 1, 1], [], []>} : vector<8x32xf32>, vector<32x128xf32>, vector<8x128xf32> -> vector<8x128xf32>
    %154 = arith.addf %152, %153 : vector<8x128xf32>
    %155 = arith.negf %154 : vector<8x128xf32>
    %156 = math.exp %155 : vector<8x128xf32>
    %cst_45 = arith.constant 1.000000e+00 : f32
    %157 = vector.broadcast %cst_45 : f32 to vector<8x128xf32>
    %158 = arith.addf %157, %156 : vector<8x128xf32>
    %159 = arith.divf %157, %158 : vector<8x128xf32>
    %160 = math.tanh %154 : vector<8x128xf32>
    %161 = vector.extract_strided_slice %159 {offsets = [0, 0], sizes = [8, 32], strides = [1, 1]} : vector<8x128xf32> to vector<8x32xf32>
    %162 = vector.extract_strided_slice %159 {offsets = [0, 32], sizes = [8, 32], strides = [1, 1]} : vector<8x128xf32> to vector<8x32xf32>
    %163 = vector.extract_strided_slice %160 {offsets = [0, 64], sizes = [8, 32], strides = [1, 1]} : vector<8x128xf32> to vector<8x32xf32>
    %164 = vector.extract_strided_slice %159 {offsets = [0, 96], sizes = [8, 32], strides = [1, 1]} : vector<8x128xf32> to vector<8x32xf32>
    %165 = arith.mulf %162, %144 : vector<8x32xf32>
    %166 = arith.mulf %161, %163 : vector<8x32xf32>
    %167 = arith.addf %165, %166 : vector<8x32xf32>
    %168 = math.tanh %167 : vector<8x32xf32>
    %169 = arith.mulf %164, %168 : vector<8x32xf32>
    %170 = arith.index_cast %150 : i32 to index
    %c0_46 = arith.constant 0 : index
    %171 = vector.load %arg13[%170, %c0_46] : memref<64x32xf32, #tpu.memory_space<vmem>>, vector<8x32xf32>
    tpu.vector_store %arg13[%170, %c0_46], %169 {strides = array<i32>} : memref<64x32xf32, #tpu.memory_space<vmem>>, vector<8x32xf32>,
    %c7_i32 = arith.constant 7 : i32
    %c8_i32_47 = arith.constant 8 : i32
    %172 = arith.muli %c7_i32, %c8_i32_47 : i32
    %173 = tpu.assume_multiple %172, 8 : i32
    %174 = arith.index_cast %173 : i32 to index
    %c0_48 = arith.constant 0 : index
    %175 = vector.load %arg12[%174, %c0_48] : memref<64x128xf32, #tpu.memory_space<vmem>>, vector<8x128xf32>
    %cst_49 = arith.constant dense<0.000000e+00> : vector<8x128xf32>
    %176 = tpu.matmul %169, %2, %cst_49 {dimension_numbers = #tpu.dot_dimension_numbers<[1], [0], [0], [1], [0, 0, 1, 1], [], []>} : vector<8x32xf32>, vector<32x128xf32>, vector<8x128xf32> -> vector<8x128xf32>
    %177 = arith.addf %175, %176 : vector<8x128xf32>
    %178 = arith.negf %177 : vector<8x128xf32>
    %179 = math.exp %178 : vector<8x128xf32>
    %cst_50 = arith.constant 1.000000e+00 : f32
    %180 = vector.broadcast %cst_50 : f32 to vector<8x128xf32>
    %181 = arith.addf %180, %179 : vector<8x128xf32>
    %182 = arith.divf %180, %181 : vector<8x128xf32>
    %183 = math.tanh %177 : vector<8x128xf32>
    %184 = vector.extract_strided_slice %182 {offsets = [0, 0], sizes = [8, 32], strides = [1, 1]} : vector<8x128xf32> to vector<8x32xf32>
    %185 = vector.extract_strided_slice %182 {offsets = [0, 32], sizes = [8, 32], strides = [1, 1]} : vector<8x128xf32> to vector<8x32xf32>
    %186 = vector.extract_strided_slice %183 {offsets = [0, 64], sizes = [8, 32], strides = [1, 1]} : vector<8x128xf32> to vector<8x32xf32>
    %187 = vector.extract_strided_slice %182 {offsets = [0, 96], sizes = [8, 32], strides = [1, 1]} : vector<8x128xf32> to vector<8x32xf32>
    %188 = arith.mulf %185, %167 : vector<8x32xf32>
    %189 = arith.mulf %184, %186 : vector<8x32xf32>
    %190 = arith.addf %188, %189 : vector<8x32xf32>
    %191 = math.tanh %190 : vector<8x32xf32>
    %192 = arith.mulf %187, %191 : vector<8x32xf32>
    %193 = arith.index_cast %173 : i32 to index
    %c0_51 = arith.constant 0 : index
    %194 = vector.load %arg13[%193, %c0_51] : memref<64x32xf32, #tpu.memory_space<vmem>>, vector<8x32xf32>
    tpu.vector_store %arg13[%193, %c0_51], %192 {strides = array<i32>} : memref<64x32xf32, #tpu.memory_space<vmem>>, vector<8x32xf32>,
    %c8_i32_52 = arith.constant 8 : i32
    %c0_53 = arith.constant 0 : index
    %c0_54 = arith.constant 0 : index
    %195 = vector.load %arg6[%c0_53, %c0_54] : memref<32x128xf32, #tpu.memory_space<vmem>>, vector<32x128xf32>
    %c0_55 = arith.constant 0 : index
    %c0_56 = arith.constant 0 : index
    %196 = vector.load %arg7[%c0_55, %c0_56] : memref<32x128xf32, #tpu.memory_space<vmem>>, vector<32x128xf32>
    %c0_57 = arith.constant 0 : index
    %c0_58 = arith.constant 0 : index
    %197 = vector.load %arg8[%c0_57, %c0_58] : memref<1x128xf32, #tpu.memory_space<vmem>>, vector<1x128xf32>
    %c0_59 = arith.constant 0 : index
    %c0_60 = arith.constant 0 : index
    %198 = vector.load %arg13[%c0_59, %c0_60] : memref<64x32xf32, #tpu.memory_space<vmem>>, vector<64x32xf32>
    %cst_61 = arith.constant dense<0.000000e+00> : vector<64x128xf32>
    %199 = tpu.matmul %198, %195, %cst_61 {dimension_numbers = #tpu.dot_dimension_numbers<[1], [0], [0], [1], [0, 0, 1, 1], [], []>} : vector<64x32xf32>, vector<32x128xf32>, vector<64x128xf32> -> vector<64x128xf32>
    %200 = vector.broadcast %197 : vector<1x128xf32> to vector<64x128xf32>
    %201 = arith.addf %199, %200 : vector<64x128xf32>
    %c0_62 = arith.constant 0 : index
    %c0_63 = arith.constant 0 : index
    %202 = vector.load %arg12[%c0_62, %c0_63] : memref<64x128xf32, #tpu.memory_space<vmem>>, vector<64x128xf32>
    tpu.vector_store %arg12[%c0_62, %c0_63], %201 {strides = array<i32>} : memref<64x128xf32, #tpu.memory_space<vmem>>, vector<64x128xf32>,
    %c0_i32_64 = arith.constant 0 : i32
    %c8_i32_65 = arith.constant 8 : i32
    %203 = arith.muli %c0_i32_64, %c8_i32_65 : i32
    %204 = tpu.assume_multiple %203, 8 : i32
    %205 = arith.index_cast %204 : i32 to index
    %c0_66 = arith.constant 0 : index
    %206 = vector.load %arg12[%205, %c0_66] : memref<64x128xf32, #tpu.memory_space<vmem>>, vector<8x128xf32>
    %cst_67 = arith.constant dense<0.000000e+00> : vector<8x128xf32>
    %207 = tpu.matmul %1, %196, %cst_67 {dimension_numbers = #tpu.dot_dimension_numbers<[1], [0], [0], [1], [0, 0, 1, 1], [], []>} : vector<8x32xf32>, vector<32x128xf32>, vector<8x128xf32> -> vector<8x128xf32>
    %208 = arith.addf %206, %207 : vector<8x128xf32>
    %209 = arith.negf %208 : vector<8x128xf32>
    %210 = math.exp %209 : vector<8x128xf32>
    %cst_68 = arith.constant 1.000000e+00 : f32
    %211 = vector.broadcast %cst_68 : f32 to vector<8x128xf32>
    %212 = arith.addf %211, %210 : vector<8x128xf32>
    %213 = arith.divf %211, %212 : vector<8x128xf32>
    %214 = math.tanh %208 : vector<8x128xf32>
    %215 = vector.extract_strided_slice %213 {offsets = [0, 0], sizes = [8, 32], strides = [1, 1]} : vector<8x128xf32> to vector<8x32xf32>
    %216 = vector.extract_strided_slice %213 {offsets = [0, 32], sizes = [8, 32], strides = [1, 1]} : vector<8x128xf32> to vector<8x32xf32>
    %217 = vector.extract_strided_slice %214 {offsets = [0, 64], sizes = [8, 32], strides = [1, 1]} : vector<8x128xf32> to vector<8x32xf32>
    %218 = vector.extract_strided_slice %213 {offsets = [0, 96], sizes = [8, 32], strides = [1, 1]} : vector<8x128xf32> to vector<8x32xf32>
    %219 = arith.mulf %216, %1 : vector<8x32xf32>
    %220 = arith.mulf %215, %217 : vector<8x32xf32>
    %221 = arith.addf %219, %220 : vector<8x32xf32>
    %222 = math.tanh %221 : vector<8x32xf32>
    %223 = arith.mulf %218, %222 : vector<8x32xf32>
    %c1_i32_69 = arith.constant 1 : i32
    %224 = arith.addi %c0_i32_64, %c1_i32_69 : i32
    %225 = vector.broadcast %224 : i32 to vector<8x1xi32>
    %226 = arith.cmpi eq, %0, %225 : vector<8x1xi32>
    %227 = vector.shape_cast %226 : vector<8x1xi1> to vector<8x1xi1>
    %228 = vector.broadcast %227 : vector<8x1xi1> to vector<8x32xi1>
    %229 = arith.select %228, %223, %1 : vector<8x32xi1>, vector<8x32xf32>
    %c1_i32_70 = arith.constant 1 : i32
    %c8_i32_71 = arith.constant 8 : i32
    %230 = arith.muli %c1_i32_70, %c8_i32_71 : i32
    %231 = tpu.assume_multiple %230, 8 : i32
    %232 = arith.index_cast %231 : i32 to index
    %c0_72 = arith.constant 0 : index
    %233 = vector.load %arg12[%232, %c0_72] : memref<64x128xf32, #tpu.memory_space<vmem>>, vector<8x128xf32>
    %cst_73 = arith.constant dense<0.000000e+00> : vector<8x128xf32>
    %234 = tpu.matmul %223, %196, %cst_73 {dimension_numbers = #tpu.dot_dimension_numbers<[1], [0], [0], [1], [0, 0, 1, 1], [], []>} : vector<8x32xf32>, vector<32x128xf32>, vector<8x128xf32> -> vector<8x128xf32>
    %235 = arith.addf %233, %234 : vector<8x128xf32>
    %236 = arith.negf %235 : vector<8x128xf32>
    %237 = math.exp %236 : vector<8x128xf32>
    %cst_74 = arith.constant 1.000000e+00 : f32
    %238 = vector.broadcast %cst_74 : f32 to vector<8x128xf32>
    %239 = arith.addf %238, %237 : vector<8x128xf32>
    %240 = arith.divf %238, %239 : vector<8x128xf32>
    %241 = math.tanh %235 : vector<8x128xf32>
    %242 = vector.extract_strided_slice %240 {offsets = [0, 0], sizes = [8, 32], strides = [1, 1]} : vector<8x128xf32> to vector<8x32xf32>
    %243 = vector.extract_strided_slice %240 {offsets = [0, 32], sizes = [8, 32], strides = [1, 1]} : vector<8x128xf32> to vector<8x32xf32>
    %244 = vector.extract_strided_slice %241 {offsets = [0, 64], sizes = [8, 32], strides = [1, 1]} : vector<8x128xf32> to vector<8x32xf32>
    %245 = vector.extract_strided_slice %240 {offsets = [0, 96], sizes = [8, 32], strides = [1, 1]} : vector<8x128xf32> to vector<8x32xf32>
    %246 = arith.mulf %243, %221 : vector<8x32xf32>
    %247 = arith.mulf %242, %244 : vector<8x32xf32>
    %248 = arith.addf %246, %247 : vector<8x32xf32>
    %249 = math.tanh %248 : vector<8x32xf32>
    %250 = arith.mulf %245, %249 : vector<8x32xf32>
    %c1_i32_75 = arith.constant 1 : i32
    %251 = arith.addi %c1_i32_70, %c1_i32_75 : i32
    %252 = vector.broadcast %251 : i32 to vector<8x1xi32>
    %253 = arith.cmpi eq, %0, %252 : vector<8x1xi32>
    %254 = vector.shape_cast %253 : vector<8x1xi1> to vector<8x1xi1>
    %255 = vector.broadcast %254 : vector<8x1xi1> to vector<8x32xi1>
    %256 = arith.select %255, %250, %229 : vector<8x32xi1>, vector<8x32xf32>
    %c2_i32_76 = arith.constant 2 : i32
    %c8_i32_77 = arith.constant 8 : i32
    %257 = arith.muli %c2_i32_76, %c8_i32_77 : i32
    %258 = tpu.assume_multiple %257, 8 : i32
    %259 = arith.index_cast %258 : i32 to index
    %c0_78 = arith.constant 0 : index
    %260 = vector.load %arg12[%259, %c0_78] : memref<64x128xf32, #tpu.memory_space<vmem>>, vector<8x128xf32>
    %cst_79 = arith.constant dense<0.000000e+00> : vector<8x128xf32>
    %261 = tpu.matmul %250, %196, %cst_79 {dimension_numbers = #tpu.dot_dimension_numbers<[1], [0], [0], [1], [0, 0, 1, 1], [], []>} : vector<8x32xf32>, vector<32x128xf32>, vector<8x128xf32> -> vector<8x128xf32>
    %262 = arith.addf %260, %261 : vector<8x128xf32>
    %263 = arith.negf %262 : vector<8x128xf32>
    %264 = math.exp %263 : vector<8x128xf32>
    %cst_80 = arith.constant 1.000000e+00 : f32
    %265 = vector.broadcast %cst_80 : f32 to vector<8x128xf32>
    %266 = arith.addf %265, %264 : vector<8x128xf32>
    %267 = arith.divf %265, %266 : vector<8x128xf32>
    %268 = math.tanh %262 : vector<8x128xf32>
    %269 = vector.extract_strided_slice %267 {offsets = [0, 0], sizes = [8, 32], strides = [1, 1]} : vector<8x128xf32> to vector<8x32xf32>
    %270 = vector.extract_strided_slice %267 {offsets = [0, 32], sizes = [8, 32], strides = [1, 1]} : vector<8x128xf32> to vector<8x32xf32>
    %271 = vector.extract_strided_slice %268 {offsets = [0, 64], sizes = [8, 32], strides = [1, 1]} : vector<8x128xf32> to vector<8x32xf32>
    %272 = vector.extract_strided_slice %267 {offsets = [0, 96], sizes = [8, 32], strides = [1, 1]} : vector<8x128xf32> to vector<8x32xf32>
    %273 = arith.mulf %270, %248 : vector<8x32xf32>
    %274 = arith.mulf %269, %271 : vector<8x32xf32>
    %275 = arith.addf %273, %274 : vector<8x32xf32>
    %276 = math.tanh %275 : vector<8x32xf32>
    %277 = arith.mulf %272, %276 : vector<8x32xf32>
    %c1_i32_81 = arith.constant 1 : i32
    %278 = arith.addi %c2_i32_76, %c1_i32_81 : i32
    %279 = vector.broadcast %278 : i32 to vector<8x1xi32>
    %280 = arith.cmpi eq, %0, %279 : vector<8x1xi32>
    %281 = vector.shape_cast %280 : vector<8x1xi1> to vector<8x1xi1>
    %282 = vector.broadcast %281 : vector<8x1xi1> to vector<8x32xi1>
    %283 = arith.select %282, %277, %256 : vector<8x32xi1>, vector<8x32xf32>
    %c3_i32_82 = arith.constant 3 : i32
    %c8_i32_83 = arith.constant 8 : i32
    %284 = arith.muli %c3_i32_82, %c8_i32_83 : i32
    %285 = tpu.assume_multiple %284, 8 : i32
    %286 = arith.index_cast %285 : i32 to index
    %c0_84 = arith.constant 0 : index
    %287 = vector.load %arg12[%286, %c0_84] : memref<64x128xf32, #tpu.memory_space<vmem>>, vector<8x128xf32>
    %cst_85 = arith.constant dense<0.000000e+00> : vector<8x128xf32>
    %288 = tpu.matmul %277, %196, %cst_85 {dimension_numbers = #tpu.dot_dimension_numbers<[1], [0], [0], [1], [0, 0, 1, 1], [], []>} : vector<8x32xf32>, vector<32x128xf32>, vector<8x128xf32> -> vector<8x128xf32>
    %289 = arith.addf %287, %288 : vector<8x128xf32>
    %290 = arith.negf %289 : vector<8x128xf32>
    %291 = math.exp %290 : vector<8x128xf32>
    %cst_86 = arith.constant 1.000000e+00 : f32
    %292 = vector.broadcast %cst_86 : f32 to vector<8x128xf32>
    %293 = arith.addf %292, %291 : vector<8x128xf32>
    %294 = arith.divf %292, %293 : vector<8x128xf32>
    %295 = math.tanh %289 : vector<8x128xf32>
    %296 = vector.extract_strided_slice %294 {offsets = [0, 0], sizes = [8, 32], strides = [1, 1]} : vector<8x128xf32> to vector<8x32xf32>
    %297 = vector.extract_strided_slice %294 {offsets = [0, 32], sizes = [8, 32], strides = [1, 1]} : vector<8x128xf32> to vector<8x32xf32>
    %298 = vector.extract_strided_slice %295 {offsets = [0, 64], sizes = [8, 32], strides = [1, 1]} : vector<8x128xf32> to vector<8x32xf32>
    %299 = vector.extract_strided_slice %294 {offsets = [0, 96], sizes = [8, 32], strides = [1, 1]} : vector<8x128xf32> to vector<8x32xf32>
    %300 = arith.mulf %297, %275 : vector<8x32xf32>
    %301 = arith.mulf %296, %298 : vector<8x32xf32>
    %302 = arith.addf %300, %301 : vector<8x32xf32>
    %303 = math.tanh %302 : vector<8x32xf32>
    %304 = arith.mulf %299, %303 : vector<8x32xf32>
    %c1_i32_87 = arith.constant 1 : i32
    %305 = arith.addi %c3_i32_82, %c1_i32_87 : i32
    %306 = vector.broadcast %305 : i32 to vector<8x1xi32>
    %307 = arith.cmpi eq, %0, %306 : vector<8x1xi32>
    %308 = vector.shape_cast %307 : vector<8x1xi1> to vector<8x1xi1>
    %309 = vector.broadcast %308 : vector<8x1xi1> to vector<8x32xi1>
    %310 = arith.select %309, %304, %283 : vector<8x32xi1>, vector<8x32xf32>
    %c4_i32_88 = arith.constant 4 : i32
    %c8_i32_89 = arith.constant 8 : i32
    %311 = arith.muli %c4_i32_88, %c8_i32_89 : i32
    %312 = tpu.assume_multiple %311, 8 : i32
    %313 = arith.index_cast %312 : i32 to index
    %c0_90 = arith.constant 0 : index
    %314 = vector.load %arg12[%313, %c0_90] : memref<64x128xf32, #tpu.memory_space<vmem>>, vector<8x128xf32>
    %cst_91 = arith.constant dense<0.000000e+00> : vector<8x128xf32>
    %315 = tpu.matmul %304, %196, %cst_91 {dimension_numbers = #tpu.dot_dimension_numbers<[1], [0], [0], [1], [0, 0, 1, 1], [], []>} : vector<8x32xf32>, vector<32x128xf32>, vector<8x128xf32> -> vector<8x128xf32>
    %316 = arith.addf %314, %315 : vector<8x128xf32>
    %317 = arith.negf %316 : vector<8x128xf32>
    %318 = math.exp %317 : vector<8x128xf32>
    %cst_92 = arith.constant 1.000000e+00 : f32
    %319 = vector.broadcast %cst_92 : f32 to vector<8x128xf32>
    %320 = arith.addf %319, %318 : vector<8x128xf32>
    %321 = arith.divf %319, %320 : vector<8x128xf32>
    %322 = math.tanh %316 : vector<8x128xf32>
    %323 = vector.extract_strided_slice %321 {offsets = [0, 0], sizes = [8, 32], strides = [1, 1]} : vector<8x128xf32> to vector<8x32xf32>
    %324 = vector.extract_strided_slice %321 {offsets = [0, 32], sizes = [8, 32], strides = [1, 1]} : vector<8x128xf32> to vector<8x32xf32>
    %325 = vector.extract_strided_slice %322 {offsets = [0, 64], sizes = [8, 32], strides = [1, 1]} : vector<8x128xf32> to vector<8x32xf32>
    %326 = vector.extract_strided_slice %321 {offsets = [0, 96], sizes = [8, 32], strides = [1, 1]} : vector<8x128xf32> to vector<8x32xf32>
    %327 = arith.mulf %324, %302 : vector<8x32xf32>
    %328 = arith.mulf %323, %325 : vector<8x32xf32>
    %329 = arith.addf %327, %328 : vector<8x32xf32>
    %330 = math.tanh %329 : vector<8x32xf32>
    %331 = arith.mulf %326, %330 : vector<8x32xf32>
    %c1_i32_93 = arith.constant 1 : i32
    %332 = arith.addi %c4_i32_88, %c1_i32_93 : i32
    %333 = vector.broadcast %332 : i32 to vector<8x1xi32>
    %334 = arith.cmpi eq, %0, %333 : vector<8x1xi32>
    %335 = vector.shape_cast %334 : vector<8x1xi1> to vector<8x1xi1>
    %336 = vector.broadcast %335 : vector<8x1xi1> to vector<8x32xi1>
    %337 = arith.select %336, %331, %310 : vector<8x32xi1>, vector<8x32xf32>
    %c5_i32_94 = arith.constant 5 : i32
    %c8_i32_95 = arith.constant 8 : i32
    %338 = arith.muli %c5_i32_94, %c8_i32_95 : i32
    %339 = tpu.assume_multiple %338, 8 : i32
    %340 = arith.index_cast %339 : i32 to index
    %c0_96 = arith.constant 0 : index
    %341 = vector.load %arg12[%340, %c0_96] : memref<64x128xf32, #tpu.memory_space<vmem>>, vector<8x128xf32>
    %cst_97 = arith.constant dense<0.000000e+00> : vector<8x128xf32>
    %342 = tpu.matmul %331, %196, %cst_97 {dimension_numbers = #tpu.dot_dimension_numbers<[1], [0], [0], [1], [0, 0, 1, 1], [], []>} : vector<8x32xf32>, vector<32x128xf32>, vector<8x128xf32> -> vector<8x128xf32>
    %343 = arith.addf %341, %342 : vector<8x128xf32>
    %344 = arith.negf %343 : vector<8x128xf32>
    %345 = math.exp %344 : vector<8x128xf32>
    %cst_98 = arith.constant 1.000000e+00 : f32
    %346 = vector.broadcast %cst_98 : f32 to vector<8x128xf32>
    %347 = arith.addf %346, %345 : vector<8x128xf32>
    %348 = arith.divf %346, %347 : vector<8x128xf32>
    %349 = math.tanh %343 : vector<8x128xf32>
    %350 = vector.extract_strided_slice %348 {offsets = [0, 0], sizes = [8, 32], strides = [1, 1]} : vector<8x128xf32> to vector<8x32xf32>
    %351 = vector.extract_strided_slice %348 {offsets = [0, 32], sizes = [8, 32], strides = [1, 1]} : vector<8x128xf32> to vector<8x32xf32>
    %352 = vector.extract_strided_slice %349 {offsets = [0, 64], sizes = [8, 32], strides = [1, 1]} : vector<8x128xf32> to vector<8x32xf32>
    %353 = vector.extract_strided_slice %348 {offsets = [0, 96], sizes = [8, 32], strides = [1, 1]} : vector<8x128xf32> to vector<8x32xf32>
    %354 = arith.mulf %351, %329 : vector<8x32xf32>
    %355 = arith.mulf %350, %352 : vector<8x32xf32>
    %356 = arith.addf %354, %355 : vector<8x32xf32>
    %357 = math.tanh %356 : vector<8x32xf32>
    %358 = arith.mulf %353, %357 : vector<8x32xf32>
    %c1_i32_99 = arith.constant 1 : i32
    %359 = arith.addi %c5_i32_94, %c1_i32_99 : i32
    %360 = vector.broadcast %359 : i32 to vector<8x1xi32>
    %361 = arith.cmpi eq, %0, %360 : vector<8x1xi32>
    %362 = vector.shape_cast %361 : vector<8x1xi1> to vector<8x1xi1>
    %363 = vector.broadcast %362 : vector<8x1xi1> to vector<8x32xi1>
    %364 = arith.select %363, %358, %337 : vector<8x32xi1>, vector<8x32xf32>
    %c6_i32_100 = arith.constant 6 : i32
    %c8_i32_101 = arith.constant 8 : i32
    %365 = arith.muli %c6_i32_100, %c8_i32_101 : i32
    %366 = tpu.assume_multiple %365, 8 : i32
    %367 = arith.index_cast %366 : i32 to index
    %c0_102 = arith.constant 0 : index
    %368 = vector.load %arg12[%367, %c0_102] : memref<64x128xf32, #tpu.memory_space<vmem>>, vector<8x128xf32>
    %cst_103 = arith.constant dense<0.000000e+00> : vector<8x128xf32>
    %369 = tpu.matmul %358, %196, %cst_103 {dimension_numbers = #tpu.dot_dimension_numbers<[1], [0], [0], [1], [0, 0, 1, 1], [], []>} : vector<8x32xf32>, vector<32x128xf32>, vector<8x128xf32> -> vector<8x128xf32>
    %370 = arith.addf %368, %369 : vector<8x128xf32>
    %371 = arith.negf %370 : vector<8x128xf32>
    %372 = math.exp %371 : vector<8x128xf32>
    %cst_104 = arith.constant 1.000000e+00 : f32
    %373 = vector.broadcast %cst_104 : f32 to vector<8x128xf32>
    %374 = arith.addf %373, %372 : vector<8x128xf32>
    %375 = arith.divf %373, %374 : vector<8x128xf32>
    %376 = math.tanh %370 : vector<8x128xf32>
    %377 = vector.extract_strided_slice %375 {offsets = [0, 0], sizes = [8, 32], strides = [1, 1]} : vector<8x128xf32> to vector<8x32xf32>
    %378 = vector.extract_strided_slice %375 {offsets = [0, 32], sizes = [8, 32], strides = [1, 1]} : vector<8x128xf32> to vector<8x32xf32>
    %379 = vector.extract_strided_slice %376 {offsets = [0, 64], sizes = [8, 32], strides = [1, 1]} : vector<8x128xf32> to vector<8x32xf32>
    %380 = vector.extract_strided_slice %375 {offsets = [0, 96], sizes = [8, 32], strides = [1, 1]} : vector<8x128xf32> to vector<8x32xf32>
    %381 = arith.mulf %378, %356 : vector<8x32xf32>
    %382 = arith.mulf %377, %379 : vector<8x32xf32>
    %383 = arith.addf %381, %382 : vector<8x32xf32>
    %384 = math.tanh %383 : vector<8x32xf32>
    %385 = arith.mulf %380, %384 : vector<8x32xf32>
    %c1_i32_105 = arith.constant 1 : i32
    %386 = arith.addi %c6_i32_100, %c1_i32_105 : i32
    %387 = vector.broadcast %386 : i32 to vector<8x1xi32>
    %388 = arith.cmpi eq, %0, %387 : vector<8x1xi32>
    %389 = vector.shape_cast %388 : vector<8x1xi1> to vector<8x1xi1>
    %390 = vector.broadcast %389 : vector<8x1xi1> to vector<8x32xi1>
    %391 = arith.select %390, %385, %364 : vector<8x32xi1>, vector<8x32xf32>
    %c7_i32_106 = arith.constant 7 : i32
    %c8_i32_107 = arith.constant 8 : i32
    %392 = arith.muli %c7_i32_106, %c8_i32_107 : i32
    %393 = tpu.assume_multiple %392, 8 : i32
    %394 = arith.index_cast %393 : i32 to index
    %c0_108 = arith.constant 0 : index
    %395 = vector.load %arg12[%394, %c0_108] : memref<64x128xf32, #tpu.memory_space<vmem>>, vector<8x128xf32>
    %cst_109 = arith.constant dense<0.000000e+00> : vector<8x128xf32>
    %396 = tpu.matmul %385, %196, %cst_109 {dimension_numbers = #tpu.dot_dimension_numbers<[1], [0], [0], [1], [0, 0, 1, 1], [], []>} : vector<8x32xf32>, vector<32x128xf32>, vector<8x128xf32> -> vector<8x128xf32>
    %397 = arith.addf %395, %396 : vector<8x128xf32>
    %398 = arith.negf %397 : vector<8x128xf32>
    %399 = math.exp %398 : vector<8x128xf32>
    %cst_110 = arith.constant 1.000000e+00 : f32
    %400 = vector.broadcast %cst_110 : f32 to vector<8x128xf32>
    %401 = arith.addf %400, %399 : vector<8x128xf32>
    %402 = arith.divf %400, %401 : vector<8x128xf32>
    %403 = math.tanh %397 : vector<8x128xf32>
    %404 = vector.extract_strided_slice %402 {offsets = [0, 0], sizes = [8, 32], strides = [1, 1]} : vector<8x128xf32> to vector<8x32xf32>
    %405 = vector.extract_strided_slice %402 {offsets = [0, 32], sizes = [8, 32], strides = [1, 1]} : vector<8x128xf32> to vector<8x32xf32>
    %406 = vector.extract_strided_slice %403 {offsets = [0, 64], sizes = [8, 32], strides = [1, 1]} : vector<8x128xf32> to vector<8x32xf32>
    %407 = vector.extract_strided_slice %402 {offsets = [0, 96], sizes = [8, 32], strides = [1, 1]} : vector<8x128xf32> to vector<8x32xf32>
    %408 = arith.mulf %405, %383 : vector<8x32xf32>
    %409 = arith.mulf %404, %406 : vector<8x32xf32>
    %410 = arith.addf %408, %409 : vector<8x32xf32>
    %411 = math.tanh %410 : vector<8x32xf32>
    %412 = arith.mulf %407, %411 : vector<8x32xf32>
    %c1_i32_111 = arith.constant 1 : i32
    %413 = arith.addi %c7_i32_106, %c1_i32_111 : i32
    %414 = vector.broadcast %413 : i32 to vector<8x1xi32>
    %415 = arith.cmpi eq, %0, %414 : vector<8x1xi32>
    %416 = vector.shape_cast %415 : vector<8x1xi1> to vector<8x1xi1>
    %417 = vector.broadcast %416 : vector<8x1xi1> to vector<8x32xi1>
    %418 = arith.select %417, %412, %391 : vector<8x32xi1>, vector<8x32xf32>
    %c8_i32_112 = arith.constant 8 : i32
    %c0_113 = arith.constant 0 : index
    %c0_114 = arith.constant 0 : index
    %419 = vector.load %arg9[%c0_113, %c0_114] : memref<32x128xf32, #tpu.memory_space<vmem>>, vector<32x128xf32>
    %cst_115 = arith.constant dense<0.000000e+00> : vector<8x128xf32>
    %420 = tpu.matmul %418, %419, %cst_115 {dimension_numbers = #tpu.dot_dimension_numbers<[1], [0], [0], [1], [0, 0, 1, 1], [], []>} : vector<8x32xf32>, vector<32x128xf32>, vector<8x128xf32> -> vector<8x128xf32>
    %c0_116 = arith.constant 0 : index
    %c0_117 = arith.constant 0 : index
    %421 = vector.load %arg10[%c0_116, %c0_117] : memref<1x128xf32, #tpu.memory_space<vmem>>, vector<1x128xf32>
    %422 = vector.broadcast %421 : vector<1x128xf32> to vector<8x128xf32>
    %423 = arith.addf %420, %422 : vector<8x128xf32>
    %c0_118 = arith.constant 0 : index
    %c0_119 = arith.constant 0 : index
    %424 = vector.load %arg11[%c0_118, %c0_119] : memref<8x128xf32, #tpu.memory_space<vmem>>, vector<8x128xf32>
    tpu.vector_store %arg11[%c0_118, %c0_119], %423 {strides = array<i32>} : memref<8x128xf32, #tpu.memory_space<vmem>>, vector<8x128xf32>,
    return
  }
  func.func @transform_0(%arg0: i32) -> (i32, i32, i32) {
    %c0_i32 = arith.constant 0 : i32
    %c0_i32_0 = arith.constant 0 : i32
    %c0_i32_1 = arith.constant 0 : i32
    return %arg0, %c0_i32, %c0_i32_0 : i32, i32, i32
  }
  func.func @transform_1(%arg0: i32) -> (i32, i32) {
    %c0_i32 = arith.constant 0 : i32
    %c0_i32_0 = arith.constant 0 : i32
    return %arg0, %c0_i32 : i32, i32
  }
  func.func @transform_2(%arg0: i32) -> (i32, i32) {
    %c0_i32 = arith.constant 0 : i32
    %c0_i32_0 = arith.constant 0 : i32
    %c0_i32_1 = arith.constant 0 : i32
    return %c0_i32, %c0_i32_0 : i32, i32
  }
  func.func @transform_3(%arg0: i32) -> (i32, i32) {
    %c0_i32 = arith.constant 0 : i32
    %c0_i32_0 = arith.constant 0 : i32
    %c0_i32_1 = arith.constant 0 : i32
    return %c0_i32, %c0_i32_0 : i32, i32
  }
  func.func @transform_4(%arg0: i32) -> (i32, i32) {
    %c0_i32 = arith.constant 0 : i32
    %c0_i32_0 = arith.constant 0 : i32
    %c0_i32_1 = arith.constant 0 : i32
    return %c0_i32, %c0_i32_0 : i32, i32
  }
  func.func @transform_5(%arg0: i32) -> (i32, i32) {
    %c0_i32 = arith.constant 0 : i32
    %c0_i32_0 = arith.constant 0 : i32
    %c0_i32_1 = arith.constant 0 : i32
    return %c0_i32, %c0_i32_0 : i32, i32
  }
  func.func @transform_6(%arg0: i32) -> (i32, i32) {
    %c0_i32 = arith.constant 0 : i32
    %c0_i32_0 = arith.constant 0 : i32
    %c0_i32_1 = arith.constant 0 : i32
    return %c0_i32, %c0_i32_0 : i32, i32
  }
  func.func @transform_7(%arg0: i32) -> (i32, i32) {
    %c0_i32 = arith.constant 0 : i32
    %c0_i32_0 = arith.constant 0 : i32
    %c0_i32_1 = arith.constant 0 : i32
    return %c0_i32, %c0_i32_0 : i32, i32
  }
  func.func @transform_8(%arg0: i32) -> (i32, i32) {
    %c0_i32 = arith.constant 0 : i32
    %c0_i32_0 = arith.constant 0 : i32
    %c0_i32_1 = arith.constant 0 : i32
    return %c0_i32, %c0_i32_0 : i32, i32
  }
  func.func @transform_9(%arg0: i32) -> (i32, i32) {
    %c0_i32 = arith.constant 0 : i32
    %c0_i32_0 = arith.constant 0 : i32
    %c0_i32_1 = arith.constant 0 : i32
    return %c0_i32, %c0_i32_0 : i32, i32
  }
  func.func @transform_10(%arg0: i32) -> (i32, i32) {
    %c0_i32 = arith.constant 0 : i32
    %c0_i32_0 = arith.constant 0 : i32
    return %arg0, %c0_i32 : i32, i32
  }
}

</mosaic_0001>

<bundles_post_ra>
// kernel: tpu_custom_call.1
= control target key start
LH: loop header
LB: loop body
LE: loop exit
PB: predicated region body
PF: predicated region fallthrough
CT: control target
= control target key end

     0   :  { %15 = vsyncpa [#allocation5], 0  ;;  %s3365_s0 = inlined_call_operand.vmem [shape: f32[1,64,16], index: 0, kind: input, shape index: {}]   ;;  %s3366_s1 = inlined_call_operand.vmem [shape: s32[8,1], index: 1, kind: input, shape index: {}]   ;;  %s3367_s2 = inlined_call_operand.hbm [shape: f32[16,128], index: 2, kind: input, shape index: {}]   ;;  %s3368_s3 = inlined_call_operand.vmem [shape: f32[1,128], index: 3, kind: input, shape index: {}]   ;;  %s3369_s4 = inlined_call_operand.vmem [shape: f32[32,128], index: 4, kind: input, shape index: {}]   ;;  %s3370_s5 = inlined_call_operand.vmem [shape: f32[32,128], index: 5, kind: input, shape index: {}]   ;;  %s3371_s6 = inlined_call_operand.vmem [shape: f32[32,128], index: 6, kind: input, shape index: {}]   ;;  %s3372_s7 = inlined_call_operand.vmem [shape: f32[1,128], index: 7, kind: input, shape index: {}]   ;;  %s3373_s8 = inlined_call_operand.hbm [shape: f32[32,128], index: 8, kind: input, shape index: {}]   ;;  %s3374_s9 = inlined_call_operand.vmem [shape: f32[1,128], index: 9, kind: input, shape index: {}]   ;;  %s3375_s10 = inlined_call_operand.hbm [shape: f32[8,128], index: 10, kind: output, shape index: {}]  }
   0x1   :  { %16 = vsyncpa [#allocation8], 0 }
   0x2   :  { %17 = vsyncpa [#allocation6], 0  ;;  %s2893_s13 = smov [#allocation4]   ;;  %s2821_s17 = scalar_lea.hbm %s3367_s2, 256 }
   0x3   :  { %s27_s14 = sshll.u32 %s2893_s13, 4  ;;  %p2822_p0 = scmp.ne.s32.totalorder %s3367_s2, %s2821_s17  ;;  %s28_s14 = int_to_ptr.vmem [resolvable:$true] %s27_s14 }
   0x4   :  { %p2825_p1 = scmp.lt.u32.totalorder %s2821_s17, %s3367_s2 }
   0x6   :  { %p2827_p2 = pnand %p2825_p1, %p2822_p0 }
   0x8   :  { %2830 = shalt.err (!%p2827_p2)
}
   0x9   :  { %s2831_s22 = scalar_lea.vmem %s28_s14, 256  ;;  %p2836_p4 = scmp.lt.s32.totalorder %s28_s14, %s28_s14 }
   0xa   :  { %p2832_p3 = scmp.ne.s32.totalorder %s28_s14, %s2831_s22  ;;  %p2837_p5 = scmp.lt.s32.totalorder %s2831_s22, %s2831_s22 }
   0xc   :  { %p2838_p6 = por %p2837_p5, %p2836_p4 }
   0xe   :  { %p2839_p7 = pnand %p2838_p6, %p2832_p3 }
  0x10   :  { %2842 = shalt.err (!%p2839_p7)
}
  0x11   :  { %s2894_s23 = smov 128   ;;  %s2895_s24 = smov 8  }
  0x12   :  { %33 = dma.hbm_to_vmem [thread:$0]  %s3367_s2, 256, %s28_s14, [#allocation5], %s2894_s23, %s2894_s23, %s2895_s24  }
  0x13   :  { %s2896_s27 = smov [#allocation7]   ;;  %s2843_s11 = scalar_lea.hbm %s3373_s8, 512 }
  0x14   :  { %s49_s28 = sshll.u32 %s2896_s27, 4  ;;  %p2844_p8 = scmp.ne.s32.totalorder %s3373_s8, %s2843_s11  ;;  %s50_s28 = int_to_ptr.vmem [resolvable:$true] %s49_s28 }
  0x15   :  { %p2847_p9 = scmp.lt.u32.totalorder %s2843_s11, %s3373_s8 }
  0x17   :  { %p2849_p10 = pnand %p2847_p9, %p2844_p8 }
  0x19   :  { %2852 = shalt.err (!%p2849_p10)
}
  0x1a   :  { %s2853_s17 = scalar_lea.vmem %s50_s28, 512  ;;  %p2858_p12 = scmp.lt.s32.totalorder %s50_s28, %s50_s28 }
  0x1b   :  { %p2854_p11 = scmp.ne.s32.totalorder %s50_s28, %s2853_s17  ;;  %p2859_p13 = scmp.lt.s32.totalorder %s2853_s17, %s2853_s17 }
  0x1d   :  { %p2860_p0 = por %p2859_p13, %p2858_p12 }
  0x1f   :  { %p2861_p1 = pnand %p2860_p0, %p2854_p11 }
  0x21   :  { %2864 = shalt.err (!%p2861_p1)
}
  0x22   :  { %55 = dma.hbm_to_vmem [thread:$0]  %s3373_s8, 512, %s50_s28, [#allocation8], %s2894_s23, %s2894_s23, %s2895_s24  }
  0x23   :  { %2887 = dma.done.wait [#allocation5], 256  }
  0x24   :  { %2888 = vsyncadd [#allocation5], 4294967040 }
  0x25   :  { %2889 = dma.done.wait [#allocation8], 512  }
  0x26   :  { %2890 = vsyncadd [#allocation8], 4294966784  ;;  %v2897_v0 = vmov 0.0|0.0   ;;  %vm2898_vm0 = vmmov 0   ;;  %v2899_v1 = vmov 0.0   ;;  %vm86_vm1 = vcmask 130048  }
  0x27   :  { %2570 = vmatprep.subr.bf16.mxu1 %v2897_v0  ;;  %2367 = vmatprep.mubr.msk.f32.mxu1 %vm2898_vm0, %v2899_v1  ;;  %v77_v2 = vld [vmem:[#allocation4] sm:$0xff]  ;;  %v78_v3 = vld [vmem:[#allocation4 + $0x8] sm:$0xff]  ;;  %v67_v9 = vld [vmem:[%s3369_s4 + $0x10] sm:$0xff]  ;;  %s2900_s30 = smov 64   ;;  %vm225_vm2 = vcmask 261120   ;;  %s2903_s2 = smov [#allocation9]  }
  0x28   :  { %v65_v4 = vld [vmem:[%s3369_s4] sm:$0xff]  ;;  %v2566_v5 = vpack.c.bf16 %v78_v3, %v77_v2  ;;  %v66_v6 = vld [vmem:[%s3369_s4 + $0x8] sm:$0xff]  ;;  %v68_v10 = vld [vmem:[%s3369_s4 + $0x18] sm:$0xff]  ;;  %s2176_s14 = sshll.u32 %s2903_s2, 4  ;;  %s2177_s14 = int_to_ptr.vmem [resolvable:$true] %s2176_s14 }
  0x29   :  { %v69_v7 = vld [vmem:[%s3365_s0] sm:$0xff]  ;;  %v2995_v8 = vpack.c.bf16 %v66_v6, %v65_v4  ;;  %v70_v11 = vld [vmem:[%s3365_s0 + $0x8] sm:$0xff]  ;;  %v3008_v12 = vpack.c.bf16 %v68_v10, %v67_v9  ;;  %v71_v48 = vld [vmem:[%s3365_s0 + $0x10] sm:$0xff]  ;;  %s2865_s18 = scalar_lea.vmem %s2177_s14, 128  ;;  %p2870_p3 = scmp.lt.s32.totalorder %s2177_s14, %s2177_s14 }
  0x2a   :  { %2347 = vmatprep.mubr.msk.f32.mxu0 %vm86_vm1, %v69_v7  ;;  %2567 = vmatprep.subr.bf16.mxu0 %v2566_v5  ;;  %v3029_v13 = vld [vmem:[%s3368_s3] ss:$0 sm:$0xff]  ;;  %s2901_s3 = smov 32   ;;  %v72_v49 = vld [vmem:[%s3365_s0 + $0x18] sm:$0xff]  ;;  %v74_v51 = vld [vmem:[%s3365_s0 + $0x28] sm:$0xff]  ;;  %p2866_p2 = scmp.ne.s32.totalorder %s2177_s14, %s2865_s18 }
  0x2b   :  { %2572 = vmatpush3.bf16.msra.mxu1 %v2995_v8  ;;  %2569 = vmatpush3.bf16.msra.mxu0 %v2566_v5  ;;  %v73_v50 = vld [vmem:[%s3365_s0 + $0x20] sm:$0xff]  ;;  %v75_v52 = vld [vmem:[%s3365_s0 + $0x30] sm:$0xff]  ;;  %v76_v53 = vld [vmem:[%s3365_s0 + $0x38] sm:$0xff]  ;;  %p2871_p4 = scmp.lt.s32.totalorder %s2865_s18, %s2865_s18 }
  0x2c   :  { %2573 = vmatprep.subr.bf16.mxu1 %v2897_v0  ;;  %2582 = vmatprep.subr.bf16.mxu0 %v2897_v0 }
  0x2d   :  { %p2872_p5 = por %p2871_p4, %p2870_p3 }
  0x2e   :  { %2348 = vmatmul.mubr.msk.f32.vlgmr.msra.gmra.mrb[0].mxu0 %vm86_vm1, %v70_v11 }
  0x2f   :  { %2575 = vmatpush3.bf16.msra.mxu1 %v3008_v12  ;;  %2584 = vmatpush3.bf16.msra.mxu0 %v2995_v8  ;;  %p2873_p6 = pnand %p2872_p5, %p2866_p2 }
  0x30   :  { %2576 = vmatprep.subr.bf16.mxu1 %v2897_v0  ;;  %2585 = vmatprep.subr.bf16.mxu0 %v2897_v0 }
  0x31   :  { %2350 = vmatprep.mubr.msk.f32.mxu0 %vm86_vm1, %v71_v48 }
  0x32   :  { %2368 = vmatmul.mubr.f32.vlgmr.msra.gmra.mrb[0].mxu1 %v2899_v1  ;;  %2351 = vmatmul.mubr.msk.f32.gmra.mrb[2].mxu0 %vm86_vm1, %v72_v49 }
  0x33   :  { %2578 = vmatpush3.bf16.msra.mxu1 %v2995_v8  ;;  %2378 = vmatprep.mubr.msk.f32.mxu1 %vm2898_vm0, %v2899_v1 }
  0x34   :  { %2579 = vmatprep.subr.bf16.mxu1 %v2897_v0  ;;  %2587 = vmatpush3.bf16.msra.mxu0 %v3008_v12 }
  0x35   :  { %2594 = vmatprep.subr.bf16.mxu0 %v2897_v0  ;;  %2353 = vmatprep.mubr.msk.f32.mxu0 %vm86_vm1, %v73_v50 }
  0x36   :  { %2354 = vmatmul.mubr.msk.f32.gmra.mrb[4].mxu0 %vm86_vm1, %v74_v51 }
  0x37   :  { %2581 = vmatpush3.bf16.msra.mxu1 %v3008_v12  ;;  %2356 = vmatprep.mubr.msk.f32.mxu0 %vm86_vm1, %v75_v52 }
  0x38   :  { %2588 = vmatprep.subr.bf16.mxu1 %v2897_v0 }
  0x3a   :  { %2357 = vmatmul.mubr.msk.f32.gmra.mrb[6].mxu0 %vm86_vm1, %v76_v53 }
  0x3b   :  { %2389 = vmatprep.mubr.msk.f32.mxu0 %vm2898_vm0, %v2899_v1 }
 0x101   :  { %v2349_v14 = vpop.f32.mrb[0].mxu0 }
 0x102   :  { %v177_v15 = vpop.f32.mrb[1].mxu0  ;;  %v183_v34 = vadd.f32 %v2349_v14, %v3029_v13 }
 0x103   :  { %v178_v16 = vadd.f32 %v3029_v13, %v177_v15 }
 0x105   :  { %v295_v17 = vpop.f32.mrb[0].mxu1  ;;  %v2352_v57 = vpop.f32.mrb[2].mxu0 }
 0x106   :  { %v299_v18 = vadd.f32 %v295_v17, %v178_v16  ;;  %v2369_v19 = vpop.f32.mrb[1].mxu1  ;;  %v187_v58 = vpop.f32.mrb[3].mxu0 }
 0x107   :  { %v188_v2 = vadd.f32 %v3029_v13, %v187_v58 }
 0x108   :  { %2693 = vtanh.f32 %v299_v18  ;;  %v2195_v21 = vmul.f32 -1.442695, %v299_v18 }
 0x109   :  { %v3075_v59 = vpop.f32.mrb[4].mxu0 }
 0x10a   :  { %2695 = vpow2.f32 %v2195_v21  ;;  %v3077_v60 = vpop.f32.mrb[5].mxu0 }
 0x10d   :  { %v3079_v61 = vpop.f32.mrb[6].mxu0 }
 0x10e   :  { %v3081_v62 = vpop.f32.mrb[7].mxu0 }
 0x112   :  { %v2694_v20 = vpop.eup %2693 }
 0x113   :  { %309 = vrot.lane.b32.xlu0 %v2694_v20, %s2900_s30 }
 0x114   :  { %v2696_v22 = vpop.eup %2695 }
 0x115   :  { %v303_v23 = vadd.f32 1.0, %v2696_v22 }
 0x117   :  { %2697 = vrcp.f32 %v303_v23  ;;  %v193_v23 = vadd.f32 %v2352_v57, %v3029_v13 }
 0x121   :  { %v2698_v24 = vpop.eup %2697 }
 0x122   :  { %v307_v27 = vmul.f32 0.0, %v2698_v24 }
 0x185   :  { %v310_v25 = vpop.permute.xlu0 %309 }
 0x186   :  { %v312_v26 = vmul.f32 %v2698_v24, %v310_v25 }
 0x188   :  { %314 = vrot.lane.b32.xlu0 %v312_v26, %s2901_s3 }
 0x1fa   :  { %v315_v28 = vpop.permute.xlu0 %314 }
 0x1fb   :  { %v317_v29 = vadd.f32 %v315_v28, %v307_v27 }
 0x1fd   :  { %2699 = vtanh.f32 %v317_v29 }
 0x207   :  { %v2700_v30 = vpop.eup %2699 }
 0x208   :  { %320 = vrot.lane.b32.xlu1 %v2700_v30, %s2900_s30 }
 0x27a   :  { %v321_v31 = vpop.permute.xlu1 %320 }
 0x27b   :  { %v323_v32 = vmul.f32 %v2698_v24, %v321_v31 }
 0x27d   :  { %325 = vrot.lane.b32.xlu1 %v323_v32, %s2901_s3 }
 0x2ef   :  { %v326_v33 = vpop.permute.xlu1 %325 }
 0x2f0   :  { %328 = vst.msk [vmem:[#allocation3] sm:$0xff] %vm225_vm2, %v326_v33  ;;  %2379 = vmatmul.mubr.msk.f32.vlgmr.msra.gmra.mrb[2].mxu1 %vm225_vm2, %v326_v33 }
 0x2f1   :  { %2590 = vmatpush3.bf16.msra.mxu1 %v2995_v8  ;;  %2400 = vmatprep.mubr.msk.f32.mxu1 %vm2898_vm0, %v2899_v1 }
 0x2f2   :  { %2591 = vmatprep.subr.bf16.mxu1 %v2897_v0 }
 0x2f5   :  { %2593 = vmatpush3.bf16.msra.mxu1 %v3008_v12 }
 0x2f6   :  { %2600 = vmatprep.subr.bf16.mxu1 %v2897_v0 }
 0x3c3   :  { %v399_v35 = vpop.f32.mrb[2].mxu1 }
 0x3c4   :  { %v403_v36 = vadd.f32 %v399_v35, %v183_v34  ;;  %v2380_v37 = vpop.f32.mrb[3].mxu1 }
 0x3c6   :  { %2701 = vtanh.f32 %v403_v36  ;;  %v2197_v39 = vmul.f32 -1.442695, %v403_v36 }
 0x3c8   :  { %2703 = vpow2.f32 %v2197_v39 }
 0x3d0   :  { %v2702_v38 = vpop.eup %2701 }
 0x3d1   :  { %413 = vrot.lane.b32.xlu0 %v2702_v38, %s2900_s30 }
 0x3d2   :  { %v2704_v40 = vpop.eup %2703 }
 0x3d3   :  { %v407_v41 = vadd.f32 1.0, %v2704_v40 }
 0x3d5   :  { %2705 = vrcp.f32 %v407_v41  ;;  %v198_v41 = vadd.f32 %v3029_v13, %v3077_v60  ;;  %v203_v60 = vadd.f32 %v3075_v59, %v3029_v13 }
 0x3df   :  { %v2706_v42 = vpop.eup %2705 }
 0x3e0   :  { %v411_v45 = vmul.f32 %v2706_v42, %v317_v29 }
 0x443   :  { %v414_v43 = vpop.permute.xlu0 %413 }
 0x444   :  { %v416_v44 = vmul.f32 %v2706_v42, %v414_v43 }
 0x446   :  { %418 = vrot.lane.b32.xlu1 %v416_v44, %s2901_s3 }
 0x4b8   :  { %v419_v46 = vpop.permute.xlu1 %418 }
 0x4b9   :  { %v421_v47 = vadd.f32 %v419_v46, %v411_v45 }
 0x4bb   :  { %2707 = vtanh.f32 %v421_v47 }
 0x4c5   :  { %v2708_v54 = vpop.eup %2707 }
 0x4c6   :  { %424 = vrot.lane.b32.xlu0 %v2708_v54, %s2900_s30 }
 0x538   :  { %v425_v55 = vpop.permute.xlu0 %424 }
 0x539   :  { %v427_v56 = vmul.f32 %v2706_v42, %v425_v55 }
 0x53b   :  { %429 = vrot.lane.b32.xlu1 %v427_v56, %s2901_s3 }
 0x5ad   :  { %v430_v63 = vpop.permute.xlu1 %429 }
 0x5ae   :  { %433 = vst.msk [vmem:[#allocation3 + $0x8] sm:$0xff] %vm225_vm2, %v430_v63  ;;  %2390 = vmatmul.mubr.msk.f32.vlgmr.msra.gmra.mrb[8].mxu0 %vm225_vm2, %v430_v63 }
 0x5af   :  { %2596 = vmatpush3.bf16.msra.mxu0 %v2995_v8  ;;  %2411 = vmatprep.mubr.msk.f32.mxu0 %vm2898_vm0, %v2899_v1 }
 0x5b0   :  { %2597 = vmatprep.subr.bf16.mxu0 %v2897_v0 }
 0x5b3   :  { %2599 = vmatpush3.bf16.msra.mxu0 %v3008_v12 }
 0x5b4   :  { %2606 = vmatprep.subr.bf16.mxu0 %v2897_v0 }
 0x681   :  { %v504_v3 = vpop.f32.mrb[8].mxu0 }
 0x682   :  { %v508_v4 = vadd.f32 %v504_v3, %v188_v2  ;;  %v2391_v5 = vpop.f32.mrb[9].mxu0 }
 0x684   :  { %2709 = vtanh.f32 %v508_v4  ;;  %v2199_v7 = vmul.f32 -1.442695, %v508_v4 }
 0x686   :  { %2711 = vpow2.f32 %v2199_v7 }
 0x68e   :  { %v2710_v6 = vpop.eup %2709 }
 0x68f   :  { %518 = vrot.lane.b32.xlu0 %v2710_v6, %s2900_s30 }
 0x690   :  { %v2712_v9 = vpop.eup %2711 }
 0x691   :  { %v512_v10 = vadd.f32 1.0, %v2712_v9 }
 0x693   :  { %2713 = vrcp.f32 %v512_v10 }
 0x69d   :  { %v2714_v11 = vpop.eup %2713 }
 0x69e   :  { %v516_v16 = vmul.f32 %v2714_v11, %v421_v47 }
 0x701   :  { %v519_v14 = vpop.permute.xlu0 %518 }
 0x702   :  { %v521_v15 = vmul.f32 %v2714_v11, %v519_v14  ;;  %v1064_v14 = vld [vmem:[%s3370_s5] sm:$0xff] }
 0x704   :  { %523 = vrot.lane.b32.xlu1 %v521_v15, %s2901_s3  ;;  %v1065_v15 = vld [vmem:[%s3370_s5 + $0x8] sm:$0xff] }
 0x776   :  { %v524_v17 = vpop.permute.xlu1 %523 }
 0x777   :  { %v526_v18 = vadd.f32 %v524_v17, %v516_v16  ;;  %v2618_v16 = vpack.c.bf16 %v1065_v15, %v1064_v14 }
 0x779   :  { %2715 = vtanh.f32 %v526_v18 }
 0x783   :  { %v2716_v19 = vpop.eup %2715 }
 0x784   :  { %529 = vrot.lane.b32.xlu0 %v2716_v19, %s2900_s30 }
 0x7f6   :  { %v530_v20 = vpop.permute.xlu0 %529 }
 0x7f7   :  { %v532_v21 = vmul.f32 %v2714_v11, %v530_v20  ;;  %v1066_v20 = vld [vmem:[%s3370_s5 + $0x10] sm:$0xff] }
 0x7f9   :  { %534 = vrot.lane.b32.xlu1 %v532_v21, %s2901_s3  ;;  %v1067_v21 = vld [vmem:[%s3370_s5 + $0x18] sm:$0xff] }
 0x86b   :  { %v535_v22 = vpop.permute.xlu1 %534 }
 0x86c   :  { %538 = vst.msk [vmem:[#allocation3 + $0x10] sm:$0xff] %vm225_vm2, %v535_v22  ;;  %2401 = vmatmul.mubr.msk.f32.vlgmr.msra.gmra.mrb[4].mxu1 %vm225_vm2, %v535_v22  ;;  %v2622_v22 = vpack.c.bf16 %v1067_v21, %v1066_v20 }
 0x86d   :  { %2602 = vmatpush3.bf16.msra.mxu1 %v2995_v8  ;;  %2422 = vmatprep.mubr.msk.f32.mxu1 %vm2898_vm0, %v2899_v1 }
 0x86e   :  { %2603 = vmatprep.subr.bf16.mxu1 %v2897_v0 }
 0x871   :  { %2605 = vmatpush3.bf16.msra.mxu1 %v3008_v12 }
 0x872   :  { %2612 = vmatprep.subr.bf16.mxu1 %v2897_v0 }
 0x93f   :  { %v609_v24 = vpop.f32.mrb[4].mxu1 }
 0x940   :  { %v613_v25 = vadd.f32 %v609_v24, %v193_v23  ;;  %v2402_v26 = vpop.f32.mrb[5].mxu1  ;;  %v1073_v24 = vld [vmem:[#allocation3] sm:$0xff] }
 0x941   :  { %v1075_v26 = vld [vmem:[#allocation3 + $0x10] sm:$0xff] }
 0x942   :  { %2717 = vtanh.f32 %v613_v25  ;;  %v2201_v28 = vmul.f32 -1.442695, %v613_v25  ;;  %v1074_v25 = vld [vmem:[#allocation3 + $0x8] sm:$0xff] }
 0x944   :  { %2719 = vpow2.f32 %v2201_v28 }
 0x94c   :  { %v2718_v27 = vpop.eup %2717 }
 0x94d   :  { %623 = vrot.lane.b32.xlu0 %v2718_v27, %s2900_s30 }
 0x94e   :  { %v2720_v29 = vpop.eup %2719 }
 0x94f   :  { %v617_v30 = vadd.f32 1.0, %v2720_v29 }
 0x951   :  { %2721 = vrcp.f32 %v617_v30  ;;  %v208_v30 = vadd.f32 %v3029_v13, %v3081_v62 }
 0x95b   :  { %v2722_v31 = vpop.eup %2721 }
 0x95c   :  { %v621_v34 = vmul.f32 %v2722_v31, %v526_v18 }
 0x9bf   :  { %v624_v32 = vpop.permute.xlu0 %623 }
 0x9c0   :  { %v626_v33 = vmul.f32 %v2722_v31, %v624_v32 }
 0x9c2   :  { %628 = vrot.lane.b32.xlu1 %v626_v33, %s2901_s3 }
 0xa34   :  { %v629_v35 = vpop.permute.xlu1 %628 }
 0xa35   :  { %v631_v36 = vadd.f32 %v629_v35, %v621_v34 }
 0xa37   :  { %2723 = vtanh.f32 %v631_v36 }
 0xa41   :  { %v2724_v37 = vpop.eup %2723 }
 0xa42   :  { %634 = vrot.lane.b32.xlu0 %v2724_v37, %s2900_s30 }
 0xab4   :  { %v635_v38 = vpop.permute.xlu0 %634 }
 0xab5   :  { %v637_v39 = vmul.f32 %v2722_v31, %v635_v38 }
 0xab7   :  { %639 = vrot.lane.b32.xlu1 %v637_v39, %s2901_s3 }
 0xb29   :  { %v640_v40 = vpop.permute.xlu1 %639 }
 0xb2a   :  { %643 = vst.msk [vmem:[#allocation3 + $0x18] sm:$0xff] %vm225_vm2, %v640_v40  ;;  %2412 = vmatmul.mubr.msk.f32.vlgmr.msra.gmra.mrb[10].mxu0 %vm225_vm2, %v640_v40 }
 0xb2b   :  { %2608 = vmatpush3.bf16.msra.mxu0 %v2995_v8  ;;  %2433 = vmatprep.mubr.msk.f32.mxu0 %vm2898_vm0, %v2899_v1 }
 0xb2c   :  { %2609 = vmatprep.subr.bf16.mxu0 %v2897_v0 }
 0xb2f   :  { %2611 = vmatpush3.bf16.msra.mxu0 %v3008_v12 }
 0xb30   :  { %2619 = vmatprep.subr.bf16.mxu0 %v2618_v16 }
 0xb31   :  { %v1076_v27 = vld [vmem:[#allocation3 + $0x18] sm:$0xff] }
 0xbfd   :  { %v714_v42 = vpop.f32.mrb[10].mxu0 }
 0xbfe   :  { %v718_v43 = vadd.f32 %v714_v42, %v198_v41  ;;  %v2413_v44 = vpop.f32.mrb[11].mxu0 }
 0xc00   :  { %2725 = vtanh.f32 %v718_v43  ;;  %v2203_v46 = vmul.f32 -1.442695, %v718_v43 }
 0xc02   :  { %2727 = vpow2.f32 %v2203_v46 }
 0xc0a   :  { %v2726_v45 = vpop.eup %2725 }
 0xc0b   :  { %728 = vrot.lane.b32.xlu0 %v2726_v45, %s2900_s30 }
 0xc0c   :  { %v2728_v47 = vpop.eup %2727 }
 0xc0d   :  { %v722_v48 = vadd.f32 1.0, %v2728_v47 }
 0xc0f   :  { %2729 = vrcp.f32 %v722_v48 }
 0xc19   :  { %v2730_v49 = vpop.eup %2729 }
 0xc1a   :  { %v726_v52 = vmul.f32 %v2730_v49, %v631_v36 }
 0xc7d   :  { %v729_v50 = vpop.permute.xlu0 %728 }
 0xc7e   :  { %v731_v51 = vmul.f32 %v2730_v49, %v729_v50  ;;  %v1068_v50 = vld [vmem:[%s3371_s6] sm:$0xff] }
 0xc80   :  { %733 = vrot.lane.b32.xlu1 %v731_v51, %s2901_s3  ;;  %v1069_v51 = vld [vmem:[%s3371_s6 + $0x8] sm:$0xff] }
 0xcf2   :  { %v734_v53 = vpop.permute.xlu1 %733 }
 0xcf3   :  { %v736_v54 = vadd.f32 %v734_v53, %v726_v52  ;;  %v3181_v52 = vpack.c.bf16 %v1069_v51, %v1068_v50  ;;  %v1070_v53 = vld [vmem:[%s3371_s6 + $0x10] sm:$0xff] }
 0xcf5   :  { %2731 = vtanh.f32 %v736_v54 }
 0xcff   :  { %v2732_v55 = vpop.eup %2731 }
 0xd00   :  { %739 = vrot.lane.b32.xlu0 %v2732_v55, %s2900_s30 }
 0xd72   :  { %v740_v56 = vpop.permute.xlu0 %739 }
 0xd73   :  { %v742_v57 = vmul.f32 %v2730_v49, %v740_v56 }
 0xd75   :  { %744 = vrot.lane.b32.xlu1 %v742_v57, %s2901_s3 }
 0xde7   :  { %v745_v58 = vpop.permute.xlu1 %744 }
 0xde8   :  { %748 = vst.msk [vmem:[#allocation3 + $0x20] sm:$0xff] %vm225_vm2, %v745_v58  ;;  %2423 = vmatmul.mubr.msk.f32.vlgmr.msra.gmra.mrb[6].mxu1 %vm225_vm2, %v745_v58 }
 0xde9   :  { %2614 = vmatpush3.bf16.msra.mxu1 %v2995_v8  ;;  %2444 = vmatprep.mubr.msk.f32.mxu1 %vm2898_vm0, %v2899_v1 }
 0xdea   :  { %2615 = vmatprep.subr.bf16.mxu1 %v2897_v0 }
 0xded   :  { %2617 = vmatpush3.bf16.msra.mxu1 %v3008_v12 }
 0xdee   :  { %2626 = vmatprep.subr.bf16.mxu1 %v2897_v0 }
 0xdef   :  { %v1077_v28 = vld [vmem:[#allocation3 + $0x20] sm:$0xff] }
 0xebb   :  { %v819_v63 = vpop.f32.mrb[6].mxu1 }
 0xebc   :  { %v823_v2 = vadd.f32 %v819_v63, %v203_v60  ;;  %v2424_v3 = vpop.f32.mrb[7].mxu1  ;;  %v213_v63 = vadd.f32 %v3079_v61, %v3029_v13 }
 0xebe   :  { %2733 = vtanh.f32 %v823_v2  ;;  %v2205_v8 = vmul.f32 -1.442695, %v823_v2 }
 0xec0   :  { %2735 = vpow2.f32 %v2205_v8  ;;  %v3217_v8 = vld [vmem:[%s3372_s7] ss:$0 sm:$0xff] }
 0xec8   :  { %v2734_v4 = vpop.eup %2733 }
 0xec9   :  { %833 = vrot.lane.b32.xlu0 %v2734_v4, %s2900_s30 }
 0xeca   :  { %v2736_v5 = vpop.eup %2735 }
 0xecb   :  { %v827_v6 = vadd.f32 1.0, %v2736_v5 }
 0xecd   :  { %2737 = vrcp.f32 %v827_v6 }
 0xed7   :  { %v2738_v7 = vpop.eup %2737 }
 0xed8   :  { %v831_v10 = vmul.f32 %v2738_v7, %v736_v54  ;;  %v1071_v54 = vld [vmem:[%s3371_s6 + $0x18] sm:$0xff] }
 0xed9   :  { %v3191_v55 = vpack.c.bf16 %v1071_v54, %v1070_v53 }
 0xf3b   :  { %v834_v9 = vpop.permute.xlu0 %833 }
 0xf3c   :  { %v836_v12 = vmul.f32 %v2738_v7, %v834_v9 }
 0xf3e   :  { %838 = vrot.lane.b32.xlu1 %v836_v12, %s2901_s3 }
 0xfb0   :  { %v839_v11 = vpop.permute.xlu1 %838 }
 0xfb1   :  { %v841_v59 = vadd.f32 %v839_v11, %v831_v10 }
 0xfb3   :  { %2739 = vtanh.f32 %v841_v59 }
 0xfbd   :  { %v2740_v17 = vpop.eup %2739 }
 0xfbe   :  { %844 = vrot.lane.b32.xlu0 %v2740_v17, %s2900_s30 }
0x1030   :  { %v845_v18 = vpop.permute.xlu0 %844 }
0x1031   :  { %v847_v19 = vmul.f32 %v2738_v7, %v845_v18 }
0x1033   :  { %849 = vrot.lane.b32.xlu1 %v847_v19, %s2901_s3 }
0x10a5   :  { %v850_v23 = vpop.permute.xlu1 %849 }
0x10a6   :  { %853 = vst.msk [vmem:[#allocation3 + $0x28] sm:$0xff] %vm225_vm2, %v850_v23  ;;  %2434 = vmatmul.mubr.msk.f32.vlgmr.msra.gmra.mrb[12].mxu0 %vm225_vm2, %v850_v23 }
0x10a7   :  { %2621 = vmatpush3.bf16.msra.mxu0 %v2618_v16  ;;  %2455 = vmatprep.mubr.msk.f32.mxu0 %vm225_vm2, %v1073_v24 }
0x10a8   :  { %2623 = vmatprep.subr.bf16.mxu0 %v2622_v22 }
0x10ab   :  { %2625 = vmatpush3.bf16.msra.mxu0 %v2622_v22 }
0x10ac   :  { %2638 = vmatprep.subr.bf16.mxu0 %v2897_v0 }
0x10ad   :  { %v1078_v29 = vld [vmem:[#allocation3 + $0x28] sm:$0xff] }
0x10ae   :  { %2456 = vmatmul.mubr.msk.f32.vlgmr.msra.gmra.mrb[14].mxu0 %vm225_vm2, %v1074_v25 }
0x10af   :  { %2458 = vmatprep.mubr.msk.f32.mxu0 %vm225_vm2, %v1075_v26  ;;  %2640 = vmatpush3.bf16.msra.mxu0 %v3181_v52 }
0x10b0   :  { %2641 = vmatprep.subr.bf16.mxu0 %v2897_v0 }
0x10b2   :  { %2459 = vmatmul.mubr.msk.f32.gmra.mrb[16].mxu0 %vm225_vm2, %v1076_v27 }
0x10b3   :  { %2461 = vmatprep.mubr.msk.f32.mxu0 %vm225_vm2, %v1077_v28  ;;  %2643 = vmatpush3.bf16.msra.mxu0 %v3191_v55 }
0x10b4   :  { %2650 = vmatprep.subr.bf16.mxu0 %v2897_v0 }
0x10b6   :  { %2462 = vmatmul.mubr.msk.f32.gmra.mrb[18].mxu0 %vm225_vm2, %v1078_v29 }
0x1179   :  { %v924_v31 = vpop.f32.mrb[12].mxu0 }
0x117a   :  { %v928_v32 = vadd.f32 %v924_v31, %v208_v30  ;;  %v2435_v33 = vpop.f32.mrb[13].mxu0 }
0x117c   :  { %2741 = vtanh.f32 %v928_v32  ;;  %v2207_v41 = vmul.f32 -1.442695, %v928_v32 }
0x117e   :  { %2743 = vpow2.f32 %v2207_v41 }
0x1181   :  { %v3159_v34 = vpop.f32.mrb[14].mxu0 }
0x1182   :  { %v1177_v35 = vpop.f32.mrb[15].mxu0 }
0x1183   :  { %v1178_v5 = vadd.f32 %v3217_v8, %v1177_v35 }
0x1185   :  { %v3161_v36 = vpop.f32.mrb[16].mxu0 }
0x1186   :  { %v2742_v37 = vpop.eup %2741  ;;  %v3163_v38 = vpop.f32.mrb[17].mxu0 }
0x1187   :  { %938 = vrot.lane.b32.xlu0 %v2742_v37, %s2900_s30  ;;  %v1183_v37 = vadd.f32 %v3159_v34, %v3217_v8 }
0x1188   :  { %v2744_v62 = vpop.eup %2743 }
0x1189   :  { %v3166_v39 = vpop.f32.mrb[18].mxu0  ;;  %v932_v42 = vadd.f32 1.0, %v2744_v62 }
0x118a   :  { %v3168_v40 = vpop.f32.mrb[19].mxu0 }
0x118b   :  { %2745 = vrcp.f32 %v932_v42 }
0x1195   :  { %v2746_v43 = vpop.eup %2745 }
0x1196   :  { %v936_v46 = vmul.f32 %v2746_v43, %v841_v59 }
0x11f9   :  { %v939_v44 = vpop.permute.xlu0 %938 }
0x11fa   :  { %v941_v45 = vmul.f32 %v2746_v43, %v939_v44 }
0x11fc   :  { %943 = vrot.lane.b32.xlu1 %v941_v45, %s2901_s3 }
0x126e   :  { %v944_v47 = vpop.permute.xlu1 %943 }
0x126f   :  { %v3171_v48 = vadd.f32 %v944_v47, %v936_v46 }
0x1271   :  { %2747 = vtanh.f32 %v3171_v48 }
0x127b   :  { %v2748_v49 = vpop.eup %2747 }
0x127c   :  { %949 = vrot.lane.b32.xlu0 %v2748_v49, %s2900_s30 }
0x12ee   :  { %v950_v56 = vpop.permute.xlu0 %949 }
0x12ef   :  { %v952_v57 = vmul.f32 %v2746_v43, %v950_v56 }
0x12f1   :  { %954 = vrot.lane.b32.xlu1 %v952_v57, %s2901_s3 }
0x1363   :  { %v955_v58 = vpop.permute.xlu1 %954 }
0x1364   :  { %958 = vst.msk [vmem:[#allocation3 + $0x30] sm:$0xff] %vm225_vm2, %v955_v58  ;;  %2445 = vmatmul.mubr.msk.f32.vlgmr.msra.gmra.mrb[8].mxu1 %vm225_vm2, %v955_v58 }
0x1365   :  { %2628 = vmatpush3.bf16.msra.mxu1 %v3181_v52  ;;  %2475 = vmatprep.mubr.msk.f32.mxu1 %vm2898_vm0, %v2899_v1 }
0x1366   :  { %2629 = vmatprep.subr.bf16.mxu1 %v2897_v0 }
0x1369   :  { %2631 = vmatpush3.bf16.msra.mxu1 %v3191_v55 }
0x136a   :  { %2632 = vmatprep.subr.bf16.mxu1 %v2897_v0 }
0x136b   :  { %v1079_v60 = vld [vmem:[#allocation3 + $0x30] sm:$0xff] }
0x136c   :  { %2476 = vmatmul.mubr.f32.vlgmr.msra.gmra.mrb[10].mxu1 %v2899_v1  ;;  %2464 = vmatprep.mubr.msk.f32.mxu0 %vm225_vm2, %v1079_v60 }
0x136d   :  { %2634 = vmatpush3.bf16.msra.mxu1 %v3181_v52  ;;  %2486 = vmatprep.mubr.msk.f32.mxu1 %vm2898_vm0, %v2899_v1 }
0x136e   :  { %2635 = vmatprep.subr.bf16.mxu1 %v2897_v0 }
0x1371   :  { %2637 = vmatpush3.bf16.msra.mxu1 %v3191_v55 }
0x1372   :  { %2644 = vmatprep.subr.bf16.mxu1 %v2897_v0 }
0x1437   :  { %v1029_v2 = vpop.f32.mrb[8].mxu1 }
0x1438   :  { %v1033_v3 = vadd.f32 %v1029_v2, %v213_v63  ;;  %v2446_v4 = vpop.f32.mrb[9].mxu1 }
0x143a   :  { %v2209_v20 = vmul.f32 -1.442695, %v1033_v3 }
0x143f   :  { %v1291_v6 = vpop.f32.mrb[10].mxu1 }
0x1440   :  { %v1295_v7 = vadd.f32 %v1291_v6, %v1178_v5  ;;  %v2477_v9 = vpop.f32.mrb[11].mxu1 }
0x1442   :  { %2749 = vtanh.f32 %v1295_v7  ;;  %v2219_v10 = vmul.f32 -1.442695, %v1295_v7 }
0x1444   :  { %2751 = vpow2.f32 %v2219_v10 }
0x144c   :  { %v2750_v12 = vpop.eup %2749 }
0x144d   :  { %1305 = vrot.lane.b32.xlu0 %v2750_v12, %s2900_s30 }
0x144e   :  { %v2752_v13 = vpop.eup %2751 }
0x144f   :  { %v1299_v61 = vadd.f32 1.0, %v2752_v13 }
0x1451   :  { %2753 = vrcp.f32 %v1299_v61 }
0x145b   :  { %v2754_v11 = vpop.eup %2753 }
0x145c   :  { %v1303_v15 = vmul.f32 0.0, %v2754_v11 }
0x14bf   :  { %v1306_v59 = vpop.permute.xlu0 %1305 }
0x14c0   :  { %v1308_v14 = vmul.f32 %v2754_v11, %v1306_v59 }
0x14c2   :  { %1310 = vrot.lane.b32.xlu1 %v1308_v14, %s2901_s3 }
0x1534   :  { %v1311_v16 = vpop.permute.xlu1 %1310 }
0x1535   :  { %v1313_v17 = vadd.f32 %v1311_v16, %v1303_v15 }
0x1537   :  { %2755 = vtanh.f32 %v1313_v17 }
0x1538   :  { %2757 = vtanh.f32 %v1033_v3  ;;  %v1188_v3 = vadd.f32 %v3217_v8, %v3163_v38 }
0x1539   :  { %2759 = vpow2.f32 %v2209_v20 }
0x1541   :  { %v2756_v18 = vpop.eup %2755 }
0x1542   :  { %1316 = vrot.lane.b32.xlu0 %v2756_v18, %s2900_s30  ;;  %v2758_v19 = vpop.eup %2757 }
0x1543   :  { %v2760_v21 = vpop.eup %2759 }
0x1544   :  { %v1037_v22 = vadd.f32 1.0, %v2760_v21 }
0x1546   :  { %1043 = vrot.lane.b32.xlu0 %v2758_v19, %s2900_s30  ;;  %2761 = vrcp.f32 %v1037_v22  ;;  %v1193_v19 = vadd.f32 %v3161_v36, %v3217_v8 }
0x1550   :  { %v2762_v25 = vpop.eup %2761 }
0x1551   :  { %v1041_v29 = vmul.f32 %v2762_v25, %v3171_v48 }
0x15b4   :  { %v1317_v23 = vpop.permute.xlu0 %1316 }
0x15b5   :  { %v3224_v24 = vmul.f32 %v2754_v11, %v1317_v23 }
0x15b7   :  { %1329 = vrot.lane.b32.xlu1 %v3224_v24, %s2901_s3 }
0x15b8   :  { %v1044_v26 = vpop.permute.xlu0 %1043 }
0x15b9   :  { %v1046_v27 = vmul.f32 %v2762_v25, %v1044_v26 }
0x15bb   :  { %1048 = vrot.lane.b32.xlu0 %v1046_v27, %s2901_s3 }
0x1629   :  { %v1330_v28 = vpop.permute.xlu1 %1329 }
0x162a   :  { %2487 = vmatmul.mubr.msk.f32.vlgmr.msra.gmra.mrb[12].mxu1 %vm225_vm2, %v1330_v28 }
0x162b   :  { %2646 = vmatpush3.bf16.msra.mxu1 %v3181_v52  ;;  %2508 = vmatprep.mubr.msk.f32.mxu1 %vm2898_vm0, %v2899_v1 }
0x162c   :  { %2647 = vmatprep.subr.bf16.mxu1 %v2897_v0 }
0x162d   :  { %v1049_v30 = vpop.permute.xlu0 %1048 }
0x162e   :  { %v1051_v31 = vadd.f32 %v1049_v30, %v1041_v29 }
0x162f   :  { %2649 = vmatpush3.bf16.msra.mxu1 %v3191_v55 }
0x1630   :  { %2763 = vtanh.f32 %v1051_v31  ;;  %2656 = vmatprep.subr.bf16.mxu1 %v2897_v0 }
0x163a   :  { %v2764_v32 = vpop.eup %2763 }
0x163b   :  { %1054 = vrot.lane.b32.xlu0 %v2764_v32, %s2900_s30 }
0x16ad   :  { %v1055_v33 = vpop.permute.xlu0 %1054 }
0x16ae   :  { %v1057_v35 = vmul.f32 %v2762_v25, %v1055_v33 }
0x16b0   :  { %1059 = vrot.lane.b32.xlu0 %v1057_v35, %s2901_s3 }
0x16fd   :  { %v1399_v41 = vpop.f32.mrb[12].mxu1 }
0x16fe   :  { %v1403_v62 = vadd.f32 %v1399_v41, %v1183_v37  ;;  %v2488_v42 = vpop.f32.mrb[13].mxu1 }
0x1700   :  { %2765 = vtanh.f32 %v1403_v62  ;;  %v2221_v46 = vmul.f32 -1.442695, %v1403_v62  ;;  %v1198_v62 = vadd.f32 %v3217_v8, %v3168_v40 }
0x1702   :  { %2767 = vpow2.f32 %v2221_v46 }
0x170a   :  { %v2766_v43 = vpop.eup %2765 }
0x170b   :  { %1413 = vrot.lane.b32.xlu1 %v2766_v43, %s2900_s30 }
0x170c   :  { %v2768_v47 = vpop.eup %2767 }
0x170d   :  { %v1407_v34 = vadd.f32 1.0, %v2768_v47 }
0x170f   :  { %2769 = vrcp.f32 %v1407_v34 }
0x1719   :  { %v2770_v48 = vpop.eup %2769 }
0x171a   :  { %v1411_v51 = vmul.f32 %v2770_v48, %v1313_v17 }
0x1722   :  { %v1060_v44 = vpop.permute.xlu0 %1059 }
0x1723   :  { %1063 = vst.msk [vmem:[#allocation3 + $0x38] sm:$0xff] %vm225_vm2, %v1060_v44 }
0x172a   :  { %v1080_v45 = vld [vmem:[#allocation3 + $0x38] sm:$0xff] }
0x172b   :  { %2465 = vmatmul.mubr.msk.f32.gmra.mrb[20].mxu0 %vm225_vm2, %v1080_v45 }
0x172c   :  { %2497 = vmatprep.mubr.msk.f32.mxu0 %vm2898_vm0, %v2899_v1 }
0x177d   :  { %v1414_v49 = vpop.permute.xlu1 %1413 }
0x177e   :  { %v1416_v50 = vmul.f32 %v2770_v48, %v1414_v49 }
0x1780   :  { %1418 = vrot.lane.b32.xlu1 %v1416_v50, %s2901_s3 }
0x17f2   :  { %v1419_v53 = vpop.permute.xlu1 %1418 }
0x17f3   :  { %v1421_v54 = vadd.f32 %v1419_v53, %v1411_v51 }
0x17f5   :  { %2771 = vtanh.f32 %v1421_v54 }
0x17fe   :  { %v3247_v56 = vpop.f32.mrb[20].mxu0 }
0x17ff   :  { %v2772_v57 = vpop.eup %2771  ;;  %v3249_v58 = vpop.f32.mrb[21].mxu0 }
0x1800   :  { %1424 = vrot.lane.b32.xlu1 %v2772_v57, %s2900_s30 }
0x1872   :  { %v1425_v60 = vpop.permute.xlu1 %1424 }
0x1873   :  { %v3252_v63 = vmul.f32 %v2770_v48, %v1425_v60 }
0x1875   :  { %1437 = vrot.lane.b32.xlu1 %v3252_v63, %s2901_s3 }
0x18e7   :  { %v1438_v2 = vpop.permute.xlu1 %1437 }
0x18e8   :  { %2498 = vmatmul.mubr.msk.f32.vlgmr.msra.gmra.mrb[22].mxu0 %vm225_vm2, %v1438_v2 }
0x18e9   :  { %2652 = vmatpush3.bf16.msra.mxu0 %v3181_v52  ;;  %2519 = vmatprep.mubr.msk.f32.mxu0 %vm2898_vm0, %v2899_v1 }
0x18ea   :  { %2653 = vmatprep.subr.bf16.mxu0 %v2897_v0 }
0x18ed   :  { %2655 = vmatpush3.bf16.msra.mxu0 %v3191_v55 }
0x18ee   :  { %2662 = vmatprep.subr.bf16.mxu0 %v2897_v0 }
0x19bb   :  { %v1507_v4 = vpop.f32.mrb[22].mxu0 }
0x19bc   :  { %v1511_v5 = vadd.f32 %v1507_v4, %v1188_v3  ;;  %v2499_v6 = vpop.f32.mrb[23].mxu0  ;;  %v1203_v3 = vadd.f32 %v3166_v39, %v3217_v8 }
0x19be   :  { %2773 = vtanh.f32 %v1511_v5  ;;  %v2223_v9 = vmul.f32 -1.442695, %v1511_v5 }
0x19c0   :  { %2775 = vpow2.f32 %v2223_v9 }
0x19c8   :  { %v2774_v7 = vpop.eup %2773 }
0x19c9   :  { %1521 = vrot.lane.b32.xlu0 %v2774_v7, %s2900_s30 }
0x19ca   :  { %v2776_v12 = vpop.eup %2775 }
0x19cb   :  { %v1515_v10 = vadd.f32 1.0, %v2776_v12 }
0x19cd   :  { %2777 = vrcp.f32 %v1515_v10 }
0x19d7   :  { %v2778_v13 = vpop.eup %2777 }
0x19d8   :  { %v1519_v59 = vmul.f32 %v2778_v13, %v1421_v54 }
0x1a3b   :  { %v1522_v61 = vpop.permute.xlu0 %1521 }
0x1a3c   :  { %v1524_v11 = vmul.f32 %v2778_v13, %v1522_v61 }
0x1a3e   :  { %1526 = vrot.lane.b32.xlu1 %v1524_v11, %s2901_s3 }
0x1ab0   :  { %v1527_v14 = vpop.permute.xlu1 %1526 }
0x1ab1   :  { %v1529_v38 = vadd.f32 %v1527_v14, %v1519_v59 }
0x1ab3   :  { %2779 = vtanh.f32 %v1529_v38 }
0x1abd   :  { %v2780_v15 = vpop.eup %2779 }
0x1abe   :  { %1532 = vrot.lane.b32.xlu0 %v2780_v15, %s2900_s30 }
0x1b30   :  { %v1533_v16 = vpop.permute.xlu0 %1532 }
0x1b31   :  { %v3268_v17 = vmul.f32 %v2778_v13, %v1533_v16  ;;  %v1208_v16 = vadd.f32 %v3217_v8, %v3249_v58 }
0x1b33   :  { %1545 = vrot.lane.b32.xlu1 %v3268_v17, %s2901_s3 }
0x1ba5   :  { %v1546_v18 = vpop.permute.xlu1 %1545 }
0x1ba6   :  { %2509 = vmatmul.mubr.msk.f32.vlgmr.msra.gmra.mrb[14].mxu1 %vm225_vm2, %v1546_v18 }
0x1ba7   :  { %2658 = vmatpush3.bf16.msra.mxu1 %v3181_v52  ;;  %2530 = vmatprep.mubr.msk.f32.mxu1 %vm2898_vm0, %v2899_v1 }
0x1ba8   :  { %2659 = vmatprep.subr.bf16.mxu1 %v2897_v0 }
0x1bab   :  { %2661 = vmatpush3.bf16.msra.mxu1 %v3191_v55 }
0x1bac   :  { %2668 = vmatprep.subr.bf16.mxu1 %v2897_v0 }
0x1c79   :  { %v1615_v20 = vpop.f32.mrb[14].mxu1 }
0x1c7a   :  { %v1619_v21 = vadd.f32 %v1615_v20, %v1193_v19  ;;  %v2510_v22 = vpop.f32.mrb[15].mxu1 }
0x1c7c   :  { %2781 = vtanh.f32 %v1619_v21  ;;  %v2225_v25 = vmul.f32 -1.442695, %v1619_v21 }
0x1c7e   :  { %2783 = vpow2.f32 %v2225_v25 }
0x1c86   :  { %v2782_v23 = vpop.eup %2781 }
0x1c87   :  { %1629 = vrot.lane.b32.xlu0 %v2782_v23, %s2900_s30 }
0x1c88   :  { %v2784_v26 = vpop.eup %2783 }
0x1c89   :  { %v1623_v27 = vadd.f32 1.0, %v2784_v26 }
0x1c8b   :  { %2785 = vrcp.f32 %v1623_v27 }
0x1c95   :  { %v2786_v28 = vpop.eup %2785 }
0x1c96   :  { %v1627_v31 = vmul.f32 %v2786_v28, %v1529_v38 }
0x1cf9   :  { %v1630_v29 = vpop.permute.xlu0 %1629 }
0x1cfa   :  { %v1632_v30 = vmul.f32 %v2786_v28, %v1630_v29 }
0x1cfc   :  { %1634 = vrot.lane.b32.xlu1 %v1632_v30, %s2901_s3 }
0x1d6e   :  { %v1635_v32 = vpop.permute.xlu1 %1634 }
0x1d6f   :  { %v1637_v36 = vadd.f32 %v1635_v32, %v1627_v31 }
0x1d71   :  { %2787 = vtanh.f32 %v1637_v36 }
0x1d7b   :  { %v2788_v33 = vpop.eup %2787 }
0x1d7c   :  { %1640 = vrot.lane.b32.xlu0 %v2788_v33, %s2900_s30  ;;  %v2902_v33 = vmov 0  }
0x1d7d   :  { %2691 = vset.pattern.permute.xlu0 %v2902_v33  ;;  %2692 = vset.pattern.permute.xlu1 %v2902_v33 }
0x1dee   :  { %v1641_v35 = vpop.permute.xlu0 %1640 }
0x1def   :  { %v3284_v37 = vmul.f32 %v2786_v28, %v1641_v35  ;;  %v1213_v35 = vadd.f32 %v3247_v56, %v3217_v8 }
0x1df1   :  { %1653 = vrot.lane.b32.xlu1 %v3284_v37, %s2901_s3 }
0x1e63   :  { %v1654_v41 = vpop.permute.xlu1 %1653 }
0x1e64   :  { %2520 = vmatmul.mubr.msk.f32.vlgmr.msra.gmra.mrb[24].mxu0 %vm225_vm2, %v1654_v41 }
0x1e65   :  { %2664 = vmatpush3.bf16.msra.mxu0 %v3181_v52  ;;  %2541 = vmatprep.mubr.msk.f32.mxu0 %vm2898_vm0, %v2899_v1 }
0x1e66   :  { %2665 = vmatprep.subr.bf16.mxu0 %v2897_v0 }
0x1e69   :  { %2667 = vmatpush3.bf16.msra.mxu0 %v3191_v55 }
0x1e6a   :  { %2674 = vmatprep.subr.bf16.mxu0 %v2897_v0 }
0x1f37   :  { %v1723_v42 = vpop.f32.mrb[24].mxu0 }
0x1f38   :  { %v1727_v43 = vadd.f32 %v1723_v42, %v1198_v62  ;;  %v2521_v44 = vpop.f32.mrb[25].mxu0 }
0x1f3a   :  { %2789 = vtanh.f32 %v1727_v43  ;;  %v2227_v46 = vmul.f32 -1.442695, %v1727_v43  ;;  %v64_v43 = vld [vmem:[%s3366_s1] sm:$0xff] }
0x1f3b   :  { %vm1320_vm3 = vcmp.eq.s32.totalorder %v64_v43, 1  ;;  %vm1644_vm4 = vcmp.eq.s32.totalorder %v64_v43, 4  ;;  %vm1860_vm5 = vcmp.eq.s32.totalorder %v64_v43, 6  ;;  %vm2076_vm6 = vcmp.eq.s32.totalorder %v64_v43, 8 }
0x1f3c   :  { %2791 = vpow2.f32 %v2227_v46  ;;  %v1645_v46 = vsel %vm1644_vm4, 1, %v2902_v33  ;;  %v2077_v8 = vsel %vm2076_vm6, 1, %v2902_v33  ;;  %vm1428_vm7 = vcmp.eq.s32.totalorder %v64_v43, 2 }
0x1f3d   :  { %vm1536_vm8 = vcmp.eq.s32.totalorder %v64_v43, 3  ;;  %vm1752_vm9 = vcmp.eq.s32.totalorder %v64_v43, 5  ;;  %vm1968_vm10 = vcmp.eq.s32.totalorder %v64_v43, 7 }
0x1f44   :  { %v2790_v45 = vpop.eup %2789 }
0x1f45   :  { %1737 = vrot.lane.b32.xlu0 %v2790_v45, %s2900_s30  ;;  %v1321_v45 = vsel %vm1320_vm3, 1, %v2902_v33 }
0x1f46   :  { %v2792_v47 = vpop.eup %2791 }
0x1f47   :  { %v1731_v34 = vadd.f32 1.0, %v2792_v47  ;;  %v1861_v47 = vsel %vm1860_vm5, 1, %v2902_v33 }
0x1f49   :  { %2793 = vrcp.f32 %v1731_v34 }
0x1f53   :  { %v2794_v48 = vpop.eup %2793 }
0x1f54   :  { %v1735_v51 = vmul.f32 %v2794_v48, %v1637_v36 }
0x1fb7   :  { %v1738_v49 = vpop.permute.xlu0 %1737 }
0x1fb8   :  { %v1740_v50 = vmul.f32 %v2794_v48, %v1738_v49 }
0x1fba   :  { %1742 = vrot.lane.b32.xlu1 %v1740_v50, %s2901_s3 }
0x202c   :  { %v1743_v53 = vpop.permute.xlu1 %1742 }
0x202d   :  { %v1745_v40 = vadd.f32 %v1743_v53, %v1735_v51  ;;  %v1429_v53 = vsel %vm1428_vm7, 1, %v2902_v33 }
0x202f   :  { %2795 = vtanh.f32 %v1745_v40 }
0x2039   :  { %v2796_v54 = vpop.eup %2795 }
0x203a   :  { %1748 = vrot.lane.b32.xlu0 %v2796_v54, %s2900_s30  ;;  %v1753_v54 = vsel %vm1752_vm9, 1, %v2902_v33 }
0x20ac   :  { %v1749_v57 = vpop.permute.xlu0 %1748 }
0x20ad   :  { %v3300_v60 = vmul.f32 %v2794_v48, %v1749_v57  ;;  %v1969_v57 = vsel %vm1968_vm10, 1, %v2902_v33 }
0x20af   :  { %1761 = vrot.lane.b32.xlu1 %v3300_v60, %s2901_s3 }
0x2121   :  { %v1762_v2 = vpop.permute.xlu1 %1761 }
0x2122   :  { %2531 = vmatmul.mubr.msk.f32.vlgmr.msra.gmra.mrb[16].mxu1 %vm225_vm2, %v1762_v2 }
0x2123   :  { %2670 = vmatpush3.bf16.msra.mxu1 %v3181_v52  ;;  %2552 = vmatprep.mubr.msk.f32.mxu1 %vm2898_vm0, %v2899_v1 }
0x2124   :  { %2671 = vmatprep.subr.bf16.mxu1 %v2897_v0 }
0x2127   :  { %2673 = vmatpush3.bf16.msra.mxu1 %v3191_v55 }
0x21f5   :  { %v1831_v4 = vpop.f32.mrb[16].mxu1 }
0x21f6   :  { %v1835_v5 = vadd.f32 %v1831_v4, %v1203_v3  ;;  %v2532_v6 = vpop.f32.mrb[17].mxu1 }
0x21f7   :  { %v2084_v6 = vld [vmem:[#allocation7 + $0x8] sm:$0xff] }
0x21f8   :  { %2797 = vtanh.f32 %v1835_v5  ;;  %v2229_v9 = vmul.f32 -1.442695, %v1835_v5  ;;  %v2083_v5 = vld [vmem:[#allocation7] sm:$0xff] }
0x21fa   :  { %2799 = vpow2.f32 %v2229_v9  ;;  %v2675_v9 = vpack.c.bf16 %v2084_v6, %v2083_v5 }
0x2202   :  { %v2798_v7 = vpop.eup %2797 }
0x2203   :  { %1845 = vrot.lane.b32.xlu0 %v2798_v7, %s2900_s30  ;;  %v2085_v7 = vld [vmem:[#allocation7 + $0x10] sm:$0xff] }
0x2204   :  { %v2800_v52 = vpop.eup %2799 }
0x2205   :  { %v1839_v12 = vadd.f32 1.0, %v2800_v52  ;;  %v2086_v52 = vld [vmem:[#allocation7 + $0x18] sm:$0xff] }
0x2207   :  { %2801 = vrcp.f32 %v1839_v12  ;;  %v2678_v12 = vpack.c.bf16 %v2086_v52, %v2085_v7 }
0x2211   :  { %v2802_v10 = vpop.eup %2801 }
0x2212   :  { %v1843_v55 = vmul.f32 %v2802_v10, %v1745_v40  ;;  %v1537_v40 = vsel %vm1536_vm8, 1, %v2902_v33 }
0x2275   :  { %v1846_v13 = vpop.permute.xlu0 %1845 }
0x2276   :  { %v1848_v61 = vmul.f32 %v2802_v10, %v1846_v13 }
0x2278   :  { %1850 = vrot.lane.b32.xlu1 %v1848_v61, %s2901_s3 }
0x22ea   :  { %v1851_v11 = vpop.permute.xlu1 %1850 }
0x22eb   :  { %v1853_v39 = vadd.f32 %v1851_v11, %v1843_v55 }
0x22ed   :  { %2803 = vtanh.f32 %v1853_v39 }
0x22f7   :  { %v2804_v59 = vpop.eup %2803 }
0x22f8   :  { %1856 = vrot.lane.b32.xlu0 %v2804_v59, %s2900_s30 }
0x236a   :  { %v1857_v14 = vpop.permute.xlu0 %1856 }
0x236b   :  { %v3315_v38 = vmul.f32 %v2802_v10, %v1857_v14 }
0x236d   :  { %1869 = vrot.lane.b32.xlu1 %v3315_v38, %s2901_s3 }
0x23df   :  { %v1870_v15 = vpop.permute.xlu1 %1869 }
0x23e0   :  { %2542 = vmatmul.mubr.msk.f32.vlgmr.msra.gmra.mrb[26].mxu0 %vm225_vm2, %v1870_v15 }
0x23e1   :  { %2563 = vmatprep.mubr.msk.f32.mxu0 %vm2898_vm0, %v2899_v1  ;;  %2676 = vmatpush3.bf16.msra.mxu0 %v2675_v9 }
0x23e2   :  { %2677 = vmatprep.subr.bf16.mxu0 %v2897_v0 }
0x23e5   :  { %2679 = vmatpush3.bf16.msra.mxu0 %v2678_v12 }
0x24b3   :  { %v1939_v18 = vpop.f32.mrb[26].mxu0 }
0x24b4   :  { %v1943_v19 = vadd.f32 %v1939_v18, %v1208_v16  ;;  %v2543_v20 = vpop.f32.mrb[27].mxu0 }
0x24b6   :  { %2805 = vtanh.f32 %v1943_v19  ;;  %v2231_v22 = vmul.f32 -1.442695, %v1943_v19 }
0x24b8   :  { %2807 = vpow2.f32 %v2231_v22 }
0x24c0   :  { %v2806_v21 = vpop.eup %2805 }
0x24c1   :  { %1953 = vrot.lane.b32.xlu0 %v2806_v21, %s2900_s30 }
0x24c2   :  { %v2808_v23 = vpop.eup %2807 }
0x24c3   :  { %v1947_v25 = vadd.f32 1.0, %v2808_v23 }
0x24c5   :  { %2809 = vrcp.f32 %v1947_v25 }
0x24cf   :  { %v2810_v26 = vpop.eup %2809 }
0x24d0   :  { %v1951_v1 = vmul.f32 %v2810_v26, %v1853_v39 }
0x2533   :  { %v1954_v27 = vpop.permute.xlu0 %1953 }
0x2534   :  { %v1956_v28 = vmul.f32 %v2810_v26, %v1954_v27 }
0x2536   :  { %1958 = vrot.lane.b32.xlu1 %v1956_v28, %s2901_s3 }
0x25a8   :  { %v1959_v29 = vpop.permute.xlu1 %1958 }
0x25a9   :  { %v1961_v58 = vadd.f32 %v1959_v29, %v1951_v1 }
0x25ab   :  { %2811 = vtanh.f32 %v1961_v58 }
0x25b5   :  { %v2812_v30 = vpop.eup %2811 }
0x25b6   :  { %1964 = vrot.lane.b32.xlu0 %v2812_v30, %s2900_s30 }
0x2628   :  { %v1965_v31 = vpop.permute.xlu0 %1964 }
0x2629   :  { %v3327_v32 = vmul.f32 %v2810_v26, %v1965_v31 }
0x262b   :  { %1977 = vrot.lane.b32.xlu1 %v3327_v32, %s2901_s3 }
0x269d   :  { %v1978_v36 = vpop.permute.xlu1 %1977 }
0x269e   :  { %2553 = vmatmul.mubr.msk.f32.vlgmr.msra.gmra.mrb[18].mxu1 %vm225_vm2, %v1978_v36 }
0x2771   :  { %v2047_v41 = vpop.f32.mrb[18].mxu1 }
0x2772   :  { %v2051_v62 = vadd.f32 %v2047_v41, %v1213_v35  ;;  %v2554_v42 = vpop.f32.mrb[19].mxu1 }
0x2774   :  { %2813 = vtanh.f32 %v2051_v62  ;;  %v2233_v56 = vmul.f32 -1.442695, %v2051_v62 }
0x2776   :  { %2815 = vpow2.f32 %v2233_v56 }
0x277e   :  { %v2814_v44 = vpop.eup %2813 }
0x277f   :  { %2061 = vrot.lane.b32.xlu0 %v2814_v44, %s2900_s30 }
0x2780   :  { %v2816_v34 = vpop.eup %2815 }
0x2781   :  { %v2055_v48 = vadd.f32 1.0, %v2816_v34 }
0x2783   :  { %1323 = vperm.xlu0 %2691, %v1321_v45   ;;  %2817 = vrcp.f32 %v2055_v48 }
0x2787   :  { %1647 = vperm.xlu0 %2691, %v1645_v46  }
0x278b   :  { %1863 = vperm.xlu0 %2691, %v1861_v47  }
0x278d   :  { %v2818_v49 = vpop.eup %2817 }
0x278e   :  { %v2059_v2 = vmul.f32 %v2818_v49, %v1961_v58 }
0x278f   :  { %2079 = vperm.xlu0 %2691, %v2077_v8  }
0x27f1   :  { %v2062_v50 = vpop.permute.xlu0 %2061 }
0x27f2   :  { %v2064_v51 = vmul.f32 %v2818_v49, %v2062_v50 }
0x27f4   :  { %2066 = vrot.lane.b32.xlu1 %v2064_v51, %s2901_s3 }
0x27f8   :  { %1431 = vperm.xlu1 %2692, %v1429_v53  }
0x27fc   :  { %1539 = vperm.xlu1 %2692, %v1537_v40  }
0x2800   :  { %1755 = vperm.xlu1 %2692, %v1753_v54  }
0x2802   :  { %v1324_v55 = vpop.permute.xlu0 %1323 }
0x2803   :  { %vm1325_vm11 = vcmp.eq.s32.totalorder %v1324_v55, 1 }
0x2804   :  { %1971 = vperm.xlu1 %2692, %v1969_v57   ;;  %v1326_v59 = vsel %vm1325_vm11, %v3224_v24, 0.0 }
0x2806   :  { %v1648_v11 = vpop.permute.xlu0 %1647 }
0x2807   :  { %vm1649_vm14 = vcmp.eq.s32.totalorder %v1648_v11, 1 }
0x280a   :  { %v1864_v0 = vpop.permute.xlu0 %1863 }
0x280b   :  { %vm1865_vm0 = vcmp.eq.s32.totalorder %v1864_v0, 1 }
0x280e   :  { %v2080_v20 = vpop.permute.xlu0 %2079 }
0x280f   :  { %vm2081_vm3 = vcmp.eq.s32.totalorder %v2080_v20, 1 }
0x2866   :  { %v2067_v3 = vpop.permute.xlu1 %2066 }
0x2867   :  { %v2069_v4 = vadd.f32 %v2067_v3, %v2059_v2 }
0x2869   :  { %2819 = vtanh.f32 %v2069_v4 }
0x2873   :  { %v2820_v10 = vpop.eup %2819 }
0x2874   :  { %2072 = vrot.lane.b32.xlu1 %v2820_v10, %s2900_s30 }
0x2877   :  { %v1432_v13 = vpop.permute.xlu1 %1431 }
0x2878   :  { %vm1433_vm12 = vcmp.eq.s32.totalorder %v1432_v13, 1 }
0x2879   :  { %v1434_v14 = vsel %vm1433_vm12, %v3252_v63, %v1326_v59 }
0x287b   :  { %v1540_v61 = vpop.permute.xlu1 %1539 }
0x287c   :  { %vm1541_vm13 = vcmp.eq.s32.totalorder %v1540_v61, 1 }
0x287d   :  { %v1542_v15 = vsel %vm1541_vm13, %v3268_v17, %v1434_v14 }
0x287e   :  { %v1650_v18 = vsel %vm1649_vm14, %v3284_v37, %v1542_v15  ;;  %v2234_v37 = vld [vmem:[%s3374_s9] ss:$0 sm:$0xff] }
0x287f   :  { %v1756_v39 = vpop.permute.xlu1 %1755 }
0x2880   :  { %vm1757_vm15 = vcmp.eq.s32.totalorder %v1756_v39, 1 }
0x2881   :  { %v1758_v19 = vsel %vm1757_vm15, %v3300_v60, %v1650_v18 }
0x2882   :  { %v1866_v22 = vsel %vm1865_vm0, %v3315_v38, %v1758_v19 }
0x2883   :  { %v1972_v16 = vpop.permute.xlu1 %1971 }
0x2884   :  { %vm1973_vm1 = vcmp.eq.s32.totalorder %v1972_v16, 1 }
0x2885   :  { %v1974_v24 = vsel %vm1973_vm1, %v3327_v32, %v1866_v22 }
0x28e6   :  { %v2073_v21 = vpop.permute.xlu1 %2072 }
0x28e7   :  { %v2075_v23 = vmul.f32 %v2818_v49, %v2073_v21 }
0x28e9   :  { %v2082_v63 = vsel %vm2081_vm3, %v2075_v23, %v1974_v24 }
0x28ea   :  { %2095 = vrot.lane.b32.xlu0 %v2082_v63, %s2901_s3 }
0x295c   :  { %v2096_v17 = vpop.permute.xlu0 %2095 }
0x295d   :  { %2564 = vmatmul.mubr.msk.f32.vlgmr.msra.gmra.mrb[28].mxu0 %vm225_vm2, %v2096_v17 }
0x2a30   :  { %v2165_v60 = vpop.f32.mrb[28].mxu0 }
0x2a31   :  { %v2166_v25 = vadd.f32 %v2234_v37, %v2165_v60  ;;  %v2565_v26 = vpop.f32.mrb[29].mxu0 }
0x2a33   :  { %2169 = vst [vmem:[#allocation9] sm:$0xff] %v2166_v25 }
0x2a34   :  { %2876 = shalt.err (!%p2873_p6)
}
0x2a35   :  { %s2877_s8 = scalar_lea.hbm %s3375_s10, 128 }
0x2a36   :  { %p2878_p7 = scmp.ne.s32.totalorder %s3375_s10, %s2877_s8  ;;  %p2881_p8 = scmp.lt.u32.totalorder %s2877_s8, %s3375_s10 }
0x2a38   :  { %p2883_p9 = pnand %p2881_p8, %p2878_p7 }
0x2a3a   :  { %2886 = shalt.err (!%p2883_p9)
}
0x2a3b   :  { %2179 = dma.vmem_to_hbm [thread:$0]  %s2177_s14, 128, %s3375_s10, [#allocation6]  }
0x2a3c   :  { %2891 = dma.done.wait [#allocation6], 128  }
0x2a3d   :  { %2892 = vsyncadd [#allocation6], 4294967168 }
0x2a3e   :  { %2183 = vsyncpa [#allocation5], 1 }
0x2a3f   :  { %2184 = vsyncpa [#allocation8], 1 }
0x2a40   :  { %2185 = vsyncpa [#allocation6], 1 }

</bundles_post_ra>
